<compile_context>
chip_gen: v6e
topology: v6e:2x2x1
jax: 0.10.0
libtpu: 0.0.40
codegen_flags: <defaults>
</compile_context>

<pallas_src>
import jax
import jax.numpy as jnp
from jax.experimental import pallas as pl
from jax.experimental.pallas import tpu as pltpu


def _round_up(x: int, m: int) -> int:
    return ((x + m - 1) // m) * m


def router_kernel(x_ref, w1_ref, b1_ref, w2_ref, b2_ref, o_ref):
    # fc1 (bf16 operands, f32 accumulation on the MXU) + bias + ReLU in f32
    h = jnp.dot(x_ref[...], w1_ref[...], preferred_element_type=jnp.float32)
    h = jnp.maximum(h + b1_ref[...], 0.0)

    # fc2 (lane-dense, padded to 128 output columns)
    logits = jnp.dot(h.astype(w2_ref.dtype), w2_ref[...],
                     preferred_element_type=jnp.float32)
    logits = logits + b2_ref[...]

    # numerically stable softmax over the (padded) last dim; padded lanes have
    # logits == -3e38 so their exp underflows to exactly 0.
    m = jnp.max(logits, axis=-1, keepdims=True)
    e = jnp.exp(logits - m)
    denom = jnp.sum(e, axis=-1, keepdims=True)
    o_ref[...] = (e * pl.reciprocal(denom, approx=True)).astype(o_ref.dtype)


def router_forward(x, w1, b1, w2, b2, *, tm=256):
    """x: [B, input_dim] f32; w1: [input_dim, hidden]; b1: [1, hidden];
       w2: [hidden, out]; b2: [1, out].  Returns [B, out] f32 softmax probs."""
    B, in_dim = x.shape
    hidden = w1.shape[1]
    out_dim = w2.shape[1]

    # --- pad fc2 output dim to a lane-dense 128 multiple -------------------
    out_pad = max(128, _round_up(out_dim, 128))
    w2_p = jnp.zeros((hidden, out_pad), jnp.float32).at[:, :out_dim].set(w2)
    b2_p = jnp.full((1, out_pad), -3e38, jnp.float32).at[:, :out_dim].set(b2)

    # --- bf16 MXU operands (weights resident in VMEM as bf16) --------------
    w1_b = w1.astype(jnp.bfloat16)
    w2_b = w2_p.astype(jnp.bfloat16)

    # --- batch tiling: tm rows per grid step, pad B up to a tile multiple ---
    tm = _round_up(max(tm, 8), 8)
    bm = min(tm, _round_up(B, 8))
    b_pad = _round_up(B, bm)
    x_b = x.astype(jnp.bfloat16)
    if b_pad != B:
        x_b = jnp.pad(x_b, ((0, b_pad - B), (0, 0)))

    grid = (b_pad // bm,)
    out = pl.pallas_call(
        router_kernel,
        out_shape=jax.ShapeDtypeStruct((b_pad, out_pad), jnp.float32),
        grid=grid,
        in_specs=[
            pl.BlockSpec((bm, in_dim), lambda i: (i, 0)),      # x: streamed per tile
            pl.BlockSpec((in_dim, hidden), lambda i: (0, 0)),  # w1: VMEM-resident
            pl.BlockSpec((1, hidden), lambda i: (0, 0)),       # b1: VMEM-resident
            pl.BlockSpec((hidden, out_pad), lambda i: (0, 0)), # w2: VMEM-resident
            pl.BlockSpec((1, out_pad), lambda i: (0, 0)),      # b2: VMEM-resident
        ],
        out_specs=pl.BlockSpec((bm, out_pad), lambda i: (i, 0)),
        compiler_params=pltpu.CompilerParams(
            dimension_semantics=("parallel",)),
    )(x_b, w1_b, b1, w2_b, b2_p)

    return out[:B, :out_dim]


def init_params(key, input_dim=384, hidden_dim=256, output_dim=5):
    """Deterministic init mirroring nn.Linear default U(-1/sqrt(fan_in), 1/sqrt(fan_in)).
       Weights stored pre-transposed as [in, out] so the kernel does x @ W."""
    k1, k2, k3, k4 = jax.random.split(key, 4)
    lim1 = 1.0 / jnp.sqrt(jnp.float32(input_dim))
    lim2 = 1.0 / jnp.sqrt(jnp.float32(hidden_dim))
    w1 = jax.random.uniform(k1, (input_dim, hidden_dim), jnp.float32, -lim1, lim1)
    b1 = jax.random.uniform(k2, (1, hidden_dim), jnp.float32, -lim1, lim1)
    w2 = jax.random.uniform(k3, (hidden_dim, output_dim), jnp.float32, -lim2, lim2)
    b2 = jax.random.uniform(k4, (1, output_dim), jnp.float32, -lim2, lim2)
    return w1, b1, w2, b2


if __name__ == "__main__":
    key = jax.random.PRNGKey(0)
    k_x, k_p = jax.random.split(key)

    input_dim, hidden_dim, output_dim = 384, 256, 5
    batch = 300  # non-multiple of the tile to exercise the padding path

    x = jax.random.normal(k_x, (batch, input_dim), dtype=jnp.float32)
    w1, b1, w2, b2 = init_params(k_p, input_dim, hidden_dim, output_dim)

    out = router_forward(x, w1, b1, w2, b2, tm=256)
    out = jax.block_until_ready(out)
    assert out.shape == (batch, output_dim)

    # Reference matching the kernel's numerics (bf16 MXU operands, f32 accumulate).
    xb, w1b, w2b = (a.astype(jnp.bfloat16) for a in (x, w1, w2))
    h_ref = jnp.maximum(jnp.dot(xb, w1b, preferred_element_type=jnp.float32) + b1, 0.0)
    logits_ref = jnp.dot(h_ref.astype(jnp.bfloat16), w2b,
                         preferred_element_type=jnp.float32) + b2
    ref = jax.nn.softmax(logits_ref, axis=-1)

    assert jnp.allclose(out, ref, atol=2e-3, rtol=2e-3), float(jnp.max(jnp.abs(out - ref)))
    assert jnp.allclose(jnp.sum(out, axis=-1), 1.0, atol=2e-3)

    print("KERNEL_OK")
</pallas_src>

<mosaic_0001>
module attributes {stable_mosaic.version = 11 : i64} {
  func.func @router_kernel(%arg0: i32, %arg1: memref<256x384xbf16, #tpu.memory_space<vmem>>, %arg2: memref<384x256xbf16, #tpu.memory_space<vmem>>, %arg3: memref<1x256xf32, #tpu.memory_space<vmem>>, %arg4: memref<256x128xbf16, #tpu.memory_space<vmem>>, %arg5: memref<1x128xf32, #tpu.memory_space<vmem>>, %arg6: memref<256x128xf32, #tpu.memory_space<vmem>>) attributes {dimension_semantics = [#tpu.dimension_semantics<parallel>], iteration_bounds = array<i64: 2>, scalar_prefetch = 0 : i64, scratch_operands = 0 : i64, tpu.core_type = #tpu.core_type<tc>, window_params = [{transform_indices = @transform_0, window_bounds = array<i64: 256, 384>}, {pipeline_mode = #tpu.pipeline_mode<synchronous>, transform_indices = @transform_1, window_bounds = array<i64: 384, 256>}, {pipeline_mode = #tpu.pipeline_mode<synchronous>, transform_indices = @transform_2, window_bounds = array<i64: 1, 256>}, {pipeline_mode = #tpu.pipeline_mode<synchronous>, transform_indices = @transform_3, window_bounds = array<i64: 256, 128>}, {pipeline_mode = #tpu.pipeline_mode<synchronous>, transform_indices = @transform_4, window_bounds = array<i64: 1, 128>}, {transform_indices = @transform_5, window_bounds = array<i64: 256, 128>}]} {
    %c0 = arith.constant 0 : index
    %c0_0 = arith.constant 0 : index
    %0 = vector.load %arg1[%c0, %c0_0] : memref<256x384xbf16, #tpu.memory_space<vmem>>, vector<256x384xbf16>
    %c0_1 = arith.constant 0 : index
    %c0_2 = arith.constant 0 : index
    %1 = vector.load %arg2[%c0_1, %c0_2] : memref<384x256xbf16, #tpu.memory_space<vmem>>, vector<384x256xbf16>
    %cst = arith.constant dense<0.000000e+00> : vector<256x256xf32>
    %2 = tpu.matmul %0, %1, %cst {dimension_numbers = #tpu.dot_dimension_numbers<[1], [0], [0], [1], [0, 0, 1, 1], [], []>} : vector<256x384xbf16>, vector<384x256xbf16>, vector<256x256xf32> -> vector<256x256xf32>
    %c0_3 = arith.constant 0 : index
    %c0_4 = arith.constant 0 : index
    %3 = vector.load %arg3[%c0_3, %c0_4] : memref<1x256xf32, #tpu.memory_space<vmem>>, vector<1x256xf32>
    %4 = vector.broadcast %3 : vector<1x256xf32> to vector<256x256xf32>
    %5 = arith.addf %2, %4 : vector<256x256xf32>
    %cst_5 = arith.constant 0.000000e+00 : f32
    %6 = vector.broadcast %cst_5 : f32 to vector<256x256xf32>
    %7 = arith.maximumf %5, %6 : vector<256x256xf32>
    %8 = arith.truncf %7 : vector<256x256xf32> to vector<256x256xbf16>
    %c0_6 = arith.constant 0 : index
    %c0_7 = arith.constant 0 : index
    %9 = vector.load %arg4[%c0_6, %c0_7] : memref<256x128xbf16, #tpu.memory_space<vmem>>, vector<256x128xbf16>
    %cst_8 = arith.constant dense<0.000000e+00> : vector<256x128xf32>
    %10 = tpu.matmul %8, %9, %cst_8 {dimension_numbers = #tpu.dot_dimension_numbers<[1], [0], [0], [1], [0, 0, 1, 1], [], []>} : vector<256x256xbf16>, vector<256x128xbf16>, vector<256x128xf32> -> vector<256x128xf32>
    %c0_9 = arith.constant 0 : index
    %c0_10 = arith.constant 0 : index
    %11 = vector.load %arg5[%c0_9, %c0_10] : memref<1x128xf32, #tpu.memory_space<vmem>>, vector<1x128xf32>
    %12 = vector.broadcast %11 : vector<1x128xf32> to vector<256x128xf32>
    %13 = arith.addf %10, %12 : vector<256x128xf32>
    %cst_11 = arith.constant dense<0xFF800000> : vector<256xf32>
    %14 = vector.multi_reduction <maximumf>, %13, %cst_11 [1] : vector<256x128xf32> to vector<256xf32>
    %15 = vector.shape_cast %14 : vector<256xf32> to vector<256x1xf32>
    %16 = vector.broadcast %15 : vector<256x1xf32> to vector<256x128xf32>
    %17 = arith.subf %13, %16 : vector<256x128xf32>
    %18 = math.exp %17 : vector<256x128xf32>
    %cst_12 = arith.constant dense<0.000000e+00> : vector<256xf32>
    %19 = vector.multi_reduction <add>, %18, %cst_12 [1] : vector<256x128xf32> to vector<256xf32>
    %20 = vector.shape_cast %19 : vector<256xf32> to vector<256x1xf32>
    %21 = tpu.reciprocal %20 {approx = true} : vector<256x1xf32> -> vector<256x1xf32>
    %22 = vector.broadcast %21 : vector<256x1xf32> to vector<256x128xf32>
    %23 = arith.mulf %18, %22 : vector<256x128xf32>
    %c0_13 = arith.constant 0 : index
    %c0_14 = arith.constant 0 : index
    %24 = vector.load %arg6[%c0_13, %c0_14] : memref<256x128xf32, #tpu.memory_space<vmem>>, vector<256x128xf32>
    tpu.vector_store %arg6[%c0_13, %c0_14], %23 {strides = array<i32>} : memref<256x128xf32, #tpu.memory_space<vmem>>, vector<256x128xf32>,
    return
  }
  func.func @transform_0(%arg0: i32) -> (i32, i32) {
    %c0_i32 = arith.constant 0 : i32
    %c0_i32_0 = arith.constant 0 : i32
    return %arg0, %c0_i32 : i32, i32
  }
  func.func @transform_1(%arg0: i32) -> (i32, i32) {
    %c0_i32 = arith.constant 0 : i32
    %c0_i32_0 = arith.constant 0 : i32
    %c0_i32_1 = arith.constant 0 : i32
    return %c0_i32, %c0_i32_0 : i32, i32
  }
  func.func @transform_2(%arg0: i32) -> (i32, i32) {
    %c0_i32 = arith.constant 0 : i32
    %c0_i32_0 = arith.constant 0 : i32
    %c0_i32_1 = arith.constant 0 : i32
    return %c0_i32, %c0_i32_0 : i32, i32
  }
  func.func @transform_3(%arg0: i32) -> (i32, i32) {
    %c0_i32 = arith.constant 0 : i32
    %c0_i32_0 = arith.constant 0 : i32
    %c0_i32_1 = arith.constant 0 : i32
    return %c0_i32, %c0_i32_0 : i32, i32
  }
  func.func @transform_4(%arg0: i32) -> (i32, i32) {
    %c0_i32 = arith.constant 0 : i32
    %c0_i32_0 = arith.constant 0 : i32
    %c0_i32_1 = arith.constant 0 : i32
    return %c0_i32, %c0_i32_0 : i32, i32
  }
  func.func @transform_5(%arg0: i32) -> (i32, i32) {
    %c0_i32 = arith.constant 0 : i32
    %c0_i32_0 = arith.constant 0 : i32
    return %arg0, %c0_i32 : i32, i32
  }
}

</mosaic_0001>

<bundles_post_ra>
// kernel: tpu_custom_call.1
= control target key start
LH: loop header
LB: loop body
LE: loop exit
PB: predicated region body
PF: predicated region fallthrough
CT: control target
= control target key end

     0   :  { %10 = vsyncpa [#allocation3], 0  ;;  %s3848_s0 = inlined_call_operand.hbm [shape: bf16[512,384], index: 0, kind: input, shape index: {}]   ;;  %s3849_s1 = inlined_call_operand.hbm [shape: bf16[384,256], index: 1, kind: input, shape index: {}]   ;;  %s3850_s2 = inlined_call_operand.vmem [shape: f32[1,256], index: 2, kind: input, shape index: {}]   ;;  %s3851_s3 = inlined_call_operand.hbm [shape: bf16[256,128], index: 3, kind: input, shape index: {}]   ;;  %s3852_s4 = inlined_call_operand.vmem [shape: f32[1,128], index: 4, kind: input, shape index: {}]   ;;  %s3853_s5 = inlined_call_operand.hbm [shape: f32[512,128], index: 5, kind: output, shape index: {}]  }
   0x1   :  { %12 = vsyncpa [#allocation3 + $0x1], 0 }
   0x2   :  { %13 = vsyncpa [#allocation6], 0 }
   0x3   :  { %14 = vsyncpa [#allocation4], 0 }
   0x4   :  { %16 = vsyncpa [#allocation4 + $0x1], 0  ;;  %s2911_s18 = smov 0   ;;  %s2913_s19 = smov 0  }
   0x5   :  { %s2915_s20 = smov 0   ;;  %s2917_s21 = smov 0  }
   0x6 LB: > { %s2932_s22 = sadd.s32 4294967295, %s2866_s21   ;;  %s2100_s23 = sadd.s32 4294967294, %s2866_s21   ;;  %s2866_s21 = sphi %s2917_s21, %s3881_s21   ;;  %s2862_s20 = sphi %s2915_s20, %s3880_s20   ;;  %s2858_s19 = sphi %s2913_s19, %s3879_s19   ;;  %s2854_s18 = sphi %s2911_s18, %s3878_s18  }
   0x7   : > { %p42_p0 = scmp.ne.s32.totalorder %s2858_s19, %s2854_s18  ;;  %p3854_p1 = scmp.eq.s32.totalorder %s2932_s22, 0 }
   0x8   : > { %p156_p3 = scmp.eq.s32.totalorder %s2100_s23, 1  ;;  %p2101_p5 = scmp.ge.s32.totalorder %s2866_s21, 1 }
   0x9   : > { %p2941_p4 = por %p3854_p1, %p42_p0  ;;  %p163_p7 = scmp.lt.s32.totalorder %s2866_s21, 3 }
   0xa   : > { %p2946_p6 = por %p156_p3, %p42_p0  ;;  %s2868_s27 = smov [#allocation5]  }
   0xb   : > { %s3858_s24 = scalar_select %p2941_p4, 1, 0 }
   0xc   : > { %s3859_s25 = scalar_select %p2946_p6, 1, 0 }
   0xd   : > { %p2951_p8 = pnand %p2101_p5, %p163_p7  ;;  %s175_s28 = sshll.u32 %s2868_s27, 4  ;;  %s176_s28 = int_to_ptr.vmem [resolvable:$true] %s175_s28 }
   0xe   : > { %s2869_s30 = smov [#allocation7]   ;;  %s2729_s7 = scalar_lea.vmem %s176_s28, 6144 }
   0xf   : > { %s3860_s26 = scalar_select %p2951_p8, 1, 0 }
  0x10   : > { %p2374_p9 = pneg %p2951_p8  ;;  %s191_s6 = sshll.u32 %s2869_s30, 4  ;;  %s192_s6 = int_to_ptr.vmem [resolvable:$true] %s191_s6 }
  0x11   : > { %p2730_p13 = scmp.ne.s32.totalorder %s176_s28, %s2729_s7  ;;  %p2737_p5 = scmp.lt.s32.totalorder %s176_s28, %s176_s28 }
  0x12   : > { %p2960_p11 = pnand %p2374_p9, %p3854_p1  ;;  %p2738_p7 = scmp.lt.s32.totalorder %s2729_s7, %s2729_s7 }
  0x14   : > { %p2720_p12 = pneg %p2960_p11  ;;  %p2739_p10 = por %p2738_p7, %p2737_p5 }
  0x16   : > { %p2732_p0 = pnand %p2730_p13, %p2720_p12 }
  0x18   : > { %p2733_p3 = pneg %p2732_p0 }
  0x1a   : > { %p2740_p9 = pnand %p2739_p10, %p2733_p3 }
  0x1c   : > { %2743 = shalt.err (!%p2740_p9)
}
  0x1d   : > { %s2870_s8 = smov 128   ;;  %s2871_s9 = smov 8  }
  0x1e   : > { %2377 = dma.hbm_to_vmem [thread:$0]  (!%p2960_p11), %s3849_s1, 6144, %s176_s28, [#allocation6], %s2870_s8, %s2870_s8, %s2871_s9  }
  0x1f   : > { %s2755_s12 = scalar_lea.vmem %s192_s6, 2048  ;;  %p2763_p2 = scmp.lt.s32.totalorder %s192_s6, %s192_s6 }
  0x20   : > { %p2756_p1 = scmp.ne.s32.totalorder %s192_s6, %s2755_s12  ;;  %p2764_p6 = scmp.lt.s32.totalorder %s2755_s12, %s2755_s12 }
  0x22   : > { %p2758_p13 = pnand %p2756_p1, %p2720_p12  ;;  %p2765_p5 = por %p2764_p6, %p2763_p2 }
  0x24   : > { %p2759_p0 = pneg %p2758_p13 }
  0x26   : > { %p2766_p10 = pnand %p2765_p5, %p2759_p0 }
  0x28   : > { %2769 = shalt.err (!%p2766_p10)
}
  0x29   : > { %s2872_s13 = smov 64   ;;  %s2873_s14 = smov 4  }
  0x2a   : > { %2380 = dma.hbm_to_vmem [thread:$0]  (!%p2960_p11), %s3851_s3, 2048, %s192_s6, [#allocation6], %s2872_s13, %s2872_s13, %s2873_s14  }
  0x2b   : > { %s2983_s17 = sadd.s32 1, %s2866_s21   ;;  %s29_s27 = sadd.s32 1, %s2862_s20 }
  0x2c   : > { %s26_s23 = ssub.s32 %s2866_s21, %s2983_s17  ;;  %p36_p2 = scmp.ne.s32.totalorder %s2862_s20, %s2858_s19 }
  0x2d   : > { %p27_p1 = scmp.eq.s32.totalorder %s26_s23, 0  ;;  %p37_p6 = scmp.eq.s32.totalorder %s2866_s21, 0 }
  0x2e   : > { %p3862_p3 = scmp.eq.s32.totalorder %s2932_s22, 1  ;;  %p2391_p9 = scmp.lt.s32.totalorder %s2866_s21, 2 }
  0x2f   : > { %s2992_s28 = scalar_select %p27_p1, %s2862_s20, %s29_s27  }
  0x30   : > { %p38_p12 = por %p37_p6, %p36_p2  ;;  %p2996_p7 = por %p3862_p3, %p36_p2 }
  0x31   : > { %s208_s29 = sand.u32 1, %s2862_s20   ;;  %s2360_s6 = smul.u32 6144, %s2866_s21 }
  0x32   : > { %s3863_s30 = scalar_select %p2996_p7, 1, 0 }
  0x33   : > { %s2359_s7 = smul.u32 384, %s208_s29  ;;  %p3003_p11 = pnand %p2391_p9, %p38_p12 }
  0x34   : > { %s3010_s11 = scalar_lea.hbm %s3848_s0, %s2360_s6  ;;  %s3014_s14 = scalar_lea.sflag [#allocation3], %s208_s29 }
  0x35   : > { %s212_s12 = scalar_lea.vmem [#allocation2], %s2359_s7  ;;  %s2770_s15 = scalar_lea.hbm %s3010_s11, 6144 }
  0x36   : > { %s220_s13 = sshll.u32 %s212_s12, 4  ;;  %p2771_p13 = scmp.ne.s32.totalorder %s3010_s11, %s2770_s15  ;;  %s3012_s13 = int_to_ptr.vmem [resolvable:$true] %s220_s13 }
  0x37   : > { %p2772_p0 = pneg %p3003_p11  ;;  %s2775_s27 = scalar_lea.hbm %s3848_s0, 12288 }
  0x38   : > { %p2776_p1 = scmp.lt.s32.totalorder %s3010_s11, %s3848_s0  ;;  %p2777_p2 = scmp.lt.s32.totalorder %s2775_s27, %s2770_s15 }
  0x39   : > { %p2773_p5 = pnand %p2772_p0, %p2771_p13 }
  0x3a   : > { %p2778_p6 = por %p2777_p2, %p2776_p1 }
  0x3b   : > { %p2774_p10 = pneg %p2773_p5 }
  0x3d   : > { %p2779_p12 = pnand %p2778_p6, %p2774_p10 }
  0x3f   : > { %2782 = shalt.err (!%p2779_p12)
}
  0x40   : > { %s2783_s29 = scalar_lea.vmem %s3012_s13, 6144  ;;  %s2874_s7 = smov [#allocation2]  }
  0x41   : > { %p2784_p3 = scmp.ne.s32.totalorder %s3012_s13, %s2783_s29  ;;  %s2788_s10 = sshll.u32 %s2874_s7, 4  ;;  %s2789_s10 = int_to_ptr.vmem [resolvable:$false] %s2788_s10 }
  0x42   : > { %s2790_s12 = scalar_lea.vmem %s2789_s10, 12288  ;;  %p2791_p5 = scmp.lt.s32.totalorder %s3012_s13, %s2789_s10 }
  0x43   : > { %p2786_p9 = pnand %p2784_p3, %p2772_p0  ;;  %p2792_p7 = scmp.lt.s32.totalorder %s2790_s12, %s2783_s29 }
  0x45   : > { %p2787_p13 = pneg %p2786_p9  ;;  %p2793_p4 = por %p2792_p7, %p2791_p5 }
  0x47   : > { %p2794_p8 = pnand %p2793_p4, %p2787_p13 }
  0x49   : > { %2797 = shalt.err (!%p2794_p8)
}
  0x4a   : > { %s2875_s15 = smov 192   ;;  %s2876_s16 = smov 12  }
  0x4b   : > { %2384 = dma.hbm_to_vmem [thread:$0]  (!%p3003_p11), %s3010_s11, 6144, %s3012_s13, %s3014_s14, %s2875_s15, %s2875_s15, %s2876_s16  }
  0x4c   : > { %p3865_p0 = scmp.ne.s32.totalorder %s3860_s26, 0 }
  0x4e   : > { %232 = sbr.rel (%p3865_p0) target bundleno = 1137 (0x471), region = 40 }
  0x53   : > { %s3038_s23 = sand.u32 1, %s2858_s19   ;;  %p3866_p4 = scmp.ne.s32.totalorder %s3858_s24, 0 }
  0x54   : > { %s2361_s27 = smul.u32 384, %s3038_s23  ;;  %s235_s6 = scalar_lea.sflag [#allocation3], %s3038_s23 }
  0x56   : > { %s3042_s9 = scalar_lea.vmem [#allocation2], %s2361_s27 }
  0x57   : > { %2841 = dma.done.wait (%p3866_p4), %s235_s6, 6144  }
  0x58   : > { %2843 = vsyncadd (%p3866_p4), %s235_s6, 4294961152  ;;  %p3867_p8 = scmp.eq.s32.totalorder %s2932_s22, 0 }
  0x5a   : > { %2845 = dma.done.wait (%p3867_p8), [#allocation6], 8192   ;;  %p3868_p7 = pmov %p3867_p8 }
  0x5b   : > { %v2877_v0 = vmov 0   ;;  %v2438_v1 = vld [vmem:[#allocation5 + $0x74] ss:$8 sps:$4 sm:$0xff]   ;;  %v2440_v2 = vld [vmem:[#allocation5 + $0x70] ss:$8 sps:$4 sm:$0xff]   ;;  %s2111_s13 = sshll.u32 %s3038_s23, 8 }
  0x5c   : > { %2847 = vsyncadd (%p3868_p7), [#allocation6], 4294959104  ;;  %1181 = vmatprep.mubr.bf16.mxu1 %v2877_v0  ;;  %896 = vmatprep.subr.bf16.mxu0 %v2438_v1  ;;  %v2441_v3 = vld [vmem:[#allocation5 + $0x64] ss:$8 sps:$4 sm:$0xff]   ;;  %v2443_v4 = vld [vmem:[#allocation5 + $0x60] ss:$8 sps:$4 sm:$0xff]  }
  0x5d   : > { %897 = vmatpush1.bf16.msra.mxu0 %v2440_v2  ;;  %v2444_v5 = vld [vmem:[#allocation5 + $0x54] ss:$8 sps:$4 sm:$0xff]   ;;  %v2446_v6 = vld [vmem:[#allocation5 + $0x50] ss:$8 sps:$4 sm:$0xff]   ;;  %v2447_v7 = vld [vmem:[#allocation5 + $0x44] ss:$8 sps:$4 sm:$0xff]  }
  0x5e   : > { %898 = vmatprep.subr.bf16.mxu0 %v2441_v3  ;;  %v2449_v8 = vld [vmem:[#allocation5 + $0x40] ss:$8 sps:$4 sm:$0xff]   ;;  %v2450_v9 = vld [vmem:[#allocation5 + $0x34] ss:$8 sps:$4 sm:$0xff]   ;;  %v2452_v10 = vld [vmem:[#allocation5 + $0x30] ss:$8 sps:$4 sm:$0xff]  }
  0x5f   : > { %v2453_v11 = vld [vmem:[#allocation5 + $0x24] ss:$8 sps:$4 sm:$0xff]   ;;  %v2455_v12 = vld [vmem:[#allocation5 + $0x20] ss:$8 sps:$4 sm:$0xff]   ;;  %v2456_v13 = vld [vmem:[#allocation5 + $0x14] ss:$8 sps:$4 sm:$0xff]  }
  0x60   : > { %v2458_v14 = vld [vmem:[#allocation5 + $0x10] ss:$8 sps:$4 sm:$0xff]   ;;  %v3056_v17 = vld [vmem:[#allocation5 + $0x174] ss:$8 sps:$4 sm:$0xff]   ;;  %v2459_v18 = vld [vmem:[#allocation5 + $0x4] ss:$8 sps:$4 sm:$0xff]  }
  0x61   : > { %899 = vmatpush1.bf16.msra.mxu0 %v2443_v4  ;;  %v2488_v15 = vld [vmem:[%s3042_s9 + $0x4] ss:$12 sps:$4 sm:$0xff]   ;;  %2343 = vmatprep.subr.bf16.mxu1 %v3056_v17  ;;  %v2461_v19 = vld [vmem:[#allocation5] ss:$8 sps:$4 sm:$0xff]   ;;  %v2462_v22 = vld [vmem:[#allocation5 + $0xf4] ss:$8 sps:$4 sm:$0xff]  }
  0x62   : > { %900 = vmatprep.subr.bf16.mxu0 %v2444_v5  ;;  %v3054_v16 = vld [vmem:[#allocation5 + $0x170] ss:$8 sps:$4 sm:$0xff]   ;;  %928 = vmatprep.mubr.bf16.mxu0 %v2488_v15  ;;  %v3060_v20 = vld [vmem:[#allocation5 + $0x160] ss:$8 sps:$4 sm:$0xff]   ;;  %v3062_v21 = vld [vmem:[#allocation5 + $0x164] ss:$8 sps:$4 sm:$0xff]  }
  0x63   : > { %2351 = vmatpush1.bf16.msra.mxu1 %v3054_v16  ;;  %v2464_v23 = vld [vmem:[#allocation5 + $0xf0] ss:$8 sps:$4 sm:$0xff]   ;;  %v3066_v24 = vld [vmem:[#allocation5 + $0x154] ss:$8 sps:$4 sm:$0xff]   ;;  %v3070_v26 = vld [vmem:[#allocation5 + $0x144] ss:$8 sps:$4 sm:$0xff]  }
  0x64   : > { %2344 = vmatprep.subr.bf16.mxu1 %v3062_v21  ;;  %v3068_v25 = vld [vmem:[#allocation5 + $0x150] ss:$8 sps:$4 sm:$0xff]   ;;  %v2465_v27 = vld [vmem:[#allocation5 + $0xe4] ss:$8 sps:$4 sm:$0xff]   ;;  %v2467_v28 = vld [vmem:[#allocation5 + $0xe0] ss:$8 sps:$4 sm:$0xff]  }
  0x65   : > { %901 = vmatpush1.bf16.msra.mxu0 %v2446_v6  ;;  %v3074_v29 = vld [vmem:[#allocation5 + $0x140] ss:$8 sps:$4 sm:$0xff]   ;;  %v3077_v30 = vld [vmem:[#allocation5 + $0x134] ss:$8 sps:$4 sm:$0xff]   ;;  %v2470_v32 = vld [vmem:[#allocation5 + $0xd0] ss:$8 sps:$4 sm:$0xff]  }
  0x66   : > { %902 = vmatprep.subr.bf16.mxu0 %v2447_v7  ;;  %v2468_v31 = vld [vmem:[#allocation5 + $0xd4] ss:$8 sps:$4 sm:$0xff]   ;;  %v3080_v33 = vld [vmem:[#allocation5 + $0x130] ss:$8 sps:$4 sm:$0xff]   ;;  %v3083_v34 = vld [vmem:[#allocation5 + $0x124] ss:$8 sps:$4 sm:$0xff]  }
  0x67   : > { %2352 = vmatpush1.bf16.msra.mxu1 %v3060_v20  ;;  %v2471_v35 = vld [vmem:[#allocation5 + $0xc4] ss:$8 sps:$4 sm:$0xff]   ;;  %v3086_v36 = vld [vmem:[#allocation5 + $0x120] ss:$8 sps:$4 sm:$0xff]   ;;  %v3089_v38 = vld [vmem:[#allocation5 + $0x114] ss:$8 sps:$4 sm:$0xff]  }
  0x68   : > { %2345 = vmatprep.subr.bf16.mxu1 %v3066_v24  ;;  %v2473_v37 = vld [vmem:[#allocation5 + $0xc0] ss:$8 sps:$4 sm:$0xff]   ;;  %v2474_v39 = vld [vmem:[#allocation5 + $0xb4] ss:$8 sps:$4 sm:$0xff]   ;;  %v2476_v40 = vld [vmem:[#allocation5 + $0xb0] ss:$8 sps:$4 sm:$0xff]  }
  0x69   : > { %903 = vmatpush1.bf16.msra.mxu0 %v2449_v8  ;;  %v3092_v41 = vld [vmem:[#allocation5 + $0x110] ss:$8 sps:$4 sm:$0xff]   ;;  %v3095_v42 = vld [vmem:[#allocation5 + $0x104] ss:$8 sps:$4 sm:$0xff]   ;;  %v3098_v44 = vld [vmem:[#allocation5 + $0x100] ss:$8 sps:$4 sm:$0xff]  }
  0x6a   : > { %904 = vmatprep.subr.bf16.mxu0 %v2450_v9  ;;  %v2477_v43 = vld [vmem:[#allocation5 + $0xa4] ss:$8 sps:$4 sm:$0xff]   ;;  %v2479_v45 = vld [vmem:[#allocation5 + $0xa0] ss:$8 sps:$4 sm:$0xff]   ;;  %v2480_v46 = vld [vmem:[#allocation5 + $0x94] ss:$8 sps:$4 sm:$0xff]  }
  0x6b   : > { %2353 = vmatpush1.bf16.msra.mxu1 %v3068_v25  ;;  %v2531_v47 = vld [vmem:[%s3042_s9 + $0x98] ss:$12 sps:$4 sm:$0xff]   ;;  %v2485_v50 = vld [vmem:[#allocation5 + $0x80] ss:$8 sps:$4 sm:$0xff]   ;;  %v2535_v51 = vld [vmem:[%s3042_s9 + $0xb0] ss:$12 sps:$4 sm:$0xff]  }
  0x6c   : > { %2346 = vmatprep.subr.bf16.mxu1 %v3070_v26  ;;  %v2482_v48 = vld [vmem:[#allocation5 + $0x90] ss:$8 sps:$4 sm:$0xff]   ;;  %v2483_v49 = vld [vmem:[#allocation5 + $0x84] ss:$8 sps:$4 sm:$0xff]   ;;  %v2492_v53 = vld [vmem:[%s3042_s9 + $0x1c] ss:$12 sps:$4 sm:$0xff]  }
  0x6d   : > { %905 = vmatpush1.bf16.msra.mxu0 %v2452_v10  ;;  %v2486_v52 = vld [vmem:[%s3042_s9] ss:$12 sps:$4 sm:$0xff]   ;;  %v2539_v54 = vld [vmem:[%s3042_s9 + $0xc8] ss:$12 sps:$4 sm:$0xff]   ;;  %v2494_v55 = vld [vmem:[%s3042_s9 + $0x18] ss:$12 sps:$4 sm:$0xff]  }
  0x6e   : > { %906 = vmatprep.subr.bf16.mxu0 %v2453_v11  ;;  %v2495_v56 = vld [vmem:[%s3042_s9 + $0x34] ss:$12 sps:$4 sm:$0xff]   ;;  %v2497_v58 = vld [vmem:[%s3042_s9 + $0x30] ss:$12 sps:$4 sm:$0xff]   ;;  %v2501_v59 = vld [vmem:[%s3042_s9 + $0x4c] ss:$12 sps:$4 sm:$0xff]  }
  0x6f   : > { %2354 = vmatpush1.bf16.msra.mxu1 %v3074_v29  ;;  %v2543_v57 = vld [vmem:[%s3042_s9 + $0xe0] ss:$12 sps:$4 sm:$0xff]   ;;  %v2547_v60 = vld [vmem:[%s3042_s9 + $0xf8] ss:$12 sps:$4 sm:$0xff]   ;;  %v2503_v61 = vld [vmem:[%s3042_s9 + $0x48] ss:$12 sps:$4 sm:$0xff]  }
  0x70   : > { %2347 = vmatprep.subr.bf16.mxu1 %v3077_v30  ;;  %v2509_v62 = vld [vmem:[%s3042_s9 + $0x64] ss:$12 sps:$4 sm:$0xff]   ;;  %v2512_v1 = vld [vmem:[%s3042_s9 + $0x60] ss:$12 sps:$4 sm:$0xff]   ;;  %v2518_v2 = vld [vmem:[%s3042_s9 + $0x7c] ss:$12 sps:$4 sm:$0xff]  }
  0x71   : > { %907 = vmatpush1.bf16.msra.mxu0 %v2455_v12  ;;  %v2551_v63 = vld [vmem:[%s3042_s9 + $0x110] ss:$12 sps:$4 sm:$0xff]   ;;  %v2555_v3 = vld [vmem:[%s3042_s9 + $0x128] ss:$12 sps:$4 sm:$0xff]   ;;  %v2521_v4 = vld [vmem:[%s3042_s9 + $0x78] ss:$12 sps:$4 sm:$0xff]  }
  0x72   : > { %908 = vmatprep.subr.bf16.mxu0 %v2456_v13  ;;  %v2527_v5 = vld [vmem:[%s3042_s9 + $0x94] ss:$12 sps:$4 sm:$0xff]   ;;  %v2530_v7 = vld [vmem:[%s3042_s9 + $0x90] ss:$12 sps:$4 sm:$0xff]   ;;  %v2532_v8 = vld [vmem:[%s3042_s9 + $0xac] ss:$12 sps:$4 sm:$0xff]  }
  0x73   : > { %2355 = vmatpush1.bf16.msra.mxu1 %v3080_v33  ;;  %v2559_v6 = vld [vmem:[%s3042_s9 + $0x140] ss:$12 sps:$4 sm:$0xff]   ;;  %v2563_v9 = vld [vmem:[%s3042_s9 + $0x158] ss:$12 sps:$4 sm:$0xff]   ;;  %v2534_v10 = vld [vmem:[%s3042_s9 + $0xa8] ss:$12 sps:$4 sm:$0xff]  }
  0x74   : > { %2348 = vmatprep.subr.bf16.mxu1 %v3083_v34  ;;  %v2536_v11 = vld [vmem:[%s3042_s9 + $0xc4] ss:$12 sps:$4 sm:$0xff]   ;;  %v2538_v13 = vld [vmem:[%s3042_s9 + $0xc0] ss:$12 sps:$4 sm:$0xff]   ;;  %s3733_s14 = scalar_lea.vmem [#allocation8], %s2111_s13  ;;  %s2230_s29 = sshll.u32 %s2932_s22, 12 }
  0x75   : > { %909 = vmatpush1.bf16.msra.mxu0 %v2458_v14  ;;  %v2567_v12 = vld [vmem:[%s3042_s9 + $0x170] ss:$12 sps:$4 sm:$0xff]   ;;  %v2542_v15 = vld [vmem:[%s3042_s9 + $0xd8] ss:$12 sps:$4 sm:$0xff]   ;;  %s2008_s7 = sshll.u32 %s3733_s14, 4  ;;  %s3801_s15 = scalar_lea.hbm %s3853_s5, %s2230_s29  ;;  %s3803_s7 = int_to_ptr.vmem [resolvable:$true] %s2008_s7 }
  0x76   : > { %910 = vmatprep.subr.bf16.mxu0 %v2459_v18  ;;  %v2540_v14 = vld [vmem:[%s3042_s9 + $0xdc] ss:$12 sps:$4 sm:$0xff]   ;;  %v2548_v18 = vld [vmem:[%s3042_s9 + $0x10c] ss:$12 sps:$4 sm:$0xff]   ;;  %s1995_s16 = scalar_lea.sflag [#allocation4], %s3038_s23  ;;  %s2798_s27 = scalar_lea.vmem %s3803_s7, 4096 }
  0x77   : > { %2356 = vmatpush1.bf16.msra.mxu1 %v3086_v36  ;;  %p2799_p11 = scmp.ne.s32.totalorder %s3803_s7, %s2798_s27  ;;  %p3875_p10 = scmp.ne.s32.totalorder %s3863_s30, 0 }
  0x78   : > { %2349 = vmatprep.subr.bf16.mxu1 %v3089_v38  ;;  %s2878_s22 = smov [#allocation8]  }
  0x79   : > { %911 = vmatpush1.bf16.msra.mxu0 %v2461_v19  ;;  %v2550_v19 = vld [vmem:[%s3042_s9 + $0x108] ss:$12 sps:$4 sm:$0xff]   ;;  %p2800_p1 = pnand %p2799_p11, %p3875_p10  ;;  %s2802_s6 = sshll.u32 %s2878_s22, 4  ;;  %s2803_s6 = int_to_ptr.vmem [resolvable:$false] %s2802_s6 }
  0x7a   : > { %912 = vmatprep.subr.bf16.mxu0 %v2462_v22  ;;  %v2556_v22 = vld [vmem:[%s3042_s9 + $0x13c] ss:$12 sps:$4 sm:$0xff]   ;;  %p2805_p6 = scmp.lt.s32.totalorder %s3803_s7, %s2803_s6 }
  0x7b   : > { %2357 = vmatpush1.bf16.msra.mxu1 %v3092_v41  ;;  %p2801_p2 = pneg %p2800_p1 }
  0x7c   : > { %2350 = vmatprep.subr.bf16.mxu1 %v3095_v42 }
  0x7d   : > { %913 = vmatpush2.bf16.msra.mxu0 %v2464_v23  ;;  %v2558_v23 = vld [vmem:[%s3042_s9 + $0x138] ss:$12 sps:$4 sm:$0xff]  }
  0x7e   : > { %914 = vmatprep.subr.bf16.mxu0 %v2465_v27  ;;  %v2566_v27 = vld [vmem:[%s3042_s9 + $0x168] ss:$12 sps:$4 sm:$0xff]  }
  0x7f   : > { %2358 = vmatpush1.bf16.msra.mxu1 %v3098_v44 }
  0x81   : > { %915 = vmatpush2.bf16.msra.mxu0 %v2467_v28  ;;  %v2568_v28 = vld [vmem:[%s3042_s9 + $0x8] ss:$12 sps:$4 sm:$0xff]  }
  0x82   : > { %916 = vmatprep.subr.bf16.mxu0 %v2468_v31  ;;  %1182 = vmatmul.mubr.bf16.vlgmr.msra.gmra.mxu1 %v2531_v47  ;;  %v2569_v31 = vld [vmem:[%s3042_s9 + $0x20] ss:$12 sps:$4 sm:$0xff]  }
  0x83   : > { %1191 = vmatprep.mubr.bf16.mxu1 %v2877_v0 }
  0x85   : > { %917 = vmatpush2.bf16.msra.mxu0 %v2470_v32  ;;  %v2570_v32 = vld [vmem:[%s3042_s9 + $0x38] ss:$12 sps:$4 sm:$0xff]  }
  0x86   : > { %918 = vmatprep.subr.bf16.mxu0 %v2471_v35  ;;  %v2571_v35 = vld [vmem:[%s3042_s9 + $0x50] ss:$12 sps:$4 sm:$0xff]  }
  0x89   : > { %919 = vmatpush2.bf16.msra.mxu0 %v2473_v37  ;;  %v2579_v37 = vld [vmem:[#allocation7 + $0x28] sm:$0xff]  }
  0x8a   : > { %920 = vmatprep.subr.bf16.mxu0 %v2474_v39  ;;  %1192 = vmatmul.mubr.bf16.gmra.mxu1 %v2535_v51  ;;  %v2580_v39 = vld [vmem:[#allocation7 + $0x60] sm:$0xff]  }
  0x8b   : > { %1201 = vmatprep.mubr.bf16.mxu1 %v2877_v0 }
  0x8d   : > { %921 = vmatpush2.bf16.msra.mxu0 %v2476_v40  ;;  %v2581_v40 = vld [vmem:[#allocation7 + $0x20] sm:$0xff]  }
  0x8e   : > { %922 = vmatprep.subr.bf16.mxu0 %v2477_v43  ;;  %v2583_v43 = vld [vmem:[#allocation7 + $0x18] sm:$0xff]  }
  0x91   : > { %923 = vmatpush2.bf16.msra.mxu0 %v2479_v45  ;;  %v2585_v45 = vld [vmem:[#allocation7 + $0x10] sm:$0xff]  }
  0x92   : > { %924 = vmatprep.subr.bf16.mxu0 %v2480_v46  ;;  %1202 = vmatmul.mubr.bf16.gmra.mxu1 %v2539_v54 }
  0x93   : > { %1211 = vmatprep.mubr.bf16.mxu1 %v2877_v0 }
  0x95   : > { %925 = vmatpush2.bf16.msra.mxu0 %v2482_v48 }
  0x96   : > { %926 = vmatprep.subr.bf16.mxu0 %v2483_v49 }
  0x99   : > { %927 = vmatpush2.bf16.msra.mxu0 %v2485_v50  ;;  %v2587_v50 = vld [vmem:[#allocation7 + $0x8] sm:$0xff]  }
  0x9a   : > { %1089 = vmatprep.subr.bf16.mxu0 %v3056_v17  ;;  %1212 = vmatmul.mubr.bf16.gmra.mxu1 %v2543_v57  ;;  %v2546_v17 = vld [vmem:[%s3042_s9 + $0xf0] ss:$12 sps:$4 sm:$0xff]  }
  0x9b   : > { %1221 = vmatprep.mubr.bf16.mxu1 %v2877_v0 }
  0x9c   : > { %929 = vmatmul.mubr.bf16.vlgmr.msra.gmra.mxu0 %v2486_v52 }
  0x9d   : > { %1090 = vmatpush1.bf16.msra.mxu0 %v3054_v16  ;;  %938 = vmatprep.mubr.bf16.mxu0 %v2492_v53  ;;  %v2544_v16 = vld [vmem:[%s3042_s9 + $0xf4] ss:$12 sps:$4 sm:$0xff]  }
  0x9e   : > { %1091 = vmatprep.subr.bf16.mxu0 %v3062_v21  ;;  %v2554_v21 = vld [vmem:[%s3042_s9 + $0x120] ss:$12 sps:$4 sm:$0xff]  }
  0xa1   : > { %1092 = vmatpush1.bf16.msra.mxu0 %v3060_v20  ;;  %v2552_v20 = vld [vmem:[%s3042_s9 + $0x124] ss:$12 sps:$4 sm:$0xff]  }
  0xa2   : > { %1093 = vmatprep.subr.bf16.mxu0 %v3066_v24  ;;  %1222 = vmatmul.mubr.bf16.gmra.mxu1 %v2547_v60  ;;  %v2560_v24 = vld [vmem:[%s3042_s9 + $0x154] ss:$12 sps:$4 sm:$0xff]  }
  0xa3   : > { %1231 = vmatprep.mubr.bf16.mxu1 %v2877_v0 }
  0xa4   : > { %939 = vmatmul.mubr.bf16.gmra.mxu0 %v2494_v55 }
  0xa5   : > { %948 = vmatprep.mubr.bf16.mxu0 %v2495_v56  ;;  %1094 = vmatpush1.bf16.msra.mxu0 %v3068_v25  ;;  %v2562_v25 = vld [vmem:[%s3042_s9 + $0x150] ss:$12 sps:$4 sm:$0xff]  }
  0xa6   : > { %1095 = vmatprep.subr.bf16.mxu0 %v3070_v26  ;;  %v2564_v26 = vld [vmem:[%s3042_s9 + $0x16c] ss:$12 sps:$4 sm:$0xff]  }
  0xa9   : > { %1096 = vmatpush1.bf16.msra.mxu0 %v3074_v29  ;;  %v2574_v29 = vld [vmem:[#allocation7 + $0x78] sm:$0xff]  }
  0xaa   : > { %1097 = vmatprep.subr.bf16.mxu0 %v3077_v30  ;;  %1232 = vmatmul.mubr.bf16.gmra.mxu1 %v2551_v63  ;;  %v2575_v30 = vld [vmem:[#allocation7 + $0x38] sm:$0xff]   ;;  %v2589_v63 = vld [vmem:[#allocation7] sm:$0xff]  }
  0xab   : > { %1241 = vmatprep.mubr.bf16.mxu1 %v2877_v0  ;;  %2231 = vmatprep.subr.bf16.mxu1 %v2574_v29 }
  0xac   : > { %949 = vmatmul.mubr.bf16.gmra.mxu0 %v2497_v58  ;;  %2232 = vmatpush3.bf16.msra.mxu1 %v2575_v30  ;;  %v388_v30 = vld [vmem:[%s3850_s2] sm:$0x3] }
  0xad   : > { %958 = vmatprep.mubr.bf16.mxu0 %v2501_v59  ;;  %1098 = vmatpush1.bf16.msra.mxu0 %v3080_v33  ;;  %v2576_v33 = vld [vmem:[#allocation7 + $0x70] sm:$0xff]  }
  0xae   : > { %1099 = vmatprep.subr.bf16.mxu0 %v3083_v34  ;;  %v2577_v34 = vld [vmem:[#allocation7 + $0x30] sm:$0xff]   ;;  %2233 = vmatprep.subr.bf16.mxu1 %v2576_v33 }
  0xb0   : > { %2234 = vmatpush3.bf16.msra.mxu1 %v2577_v34 }
  0xb1   : > { %1100 = vmatpush1.bf16.msra.mxu0 %v3086_v36  ;;  %v2578_v36 = vld [vmem:[#allocation7 + $0x68] sm:$0xff]  }
  0xb2   : > { %1101 = vmatprep.subr.bf16.mxu0 %v3089_v38  ;;  %1242 = vmatmul.mubr.bf16.gmra.mxu1 %v2555_v3  ;;  %v2572_v38 = vld [vmem:[%s3042_s9 + $0x68] ss:$12 sps:$4 sm:$0xff]  }
  0xb3   : > { %1251 = vmatprep.mubr.bf16.mxu1 %v2877_v0  ;;  %2235 = vmatprep.subr.bf16.mxu1 %v2578_v36 }
  0xb4   : > { %959 = vmatmul.mubr.bf16.gmra.mxu0 %v2503_v61  ;;  %2236 = vmatpush3.bf16.msra.mxu1 %v2579_v37  ;;  %v2588_v61 = vld [vmem:[#allocation7 + $0x40] sm:$0xff]  }
  0xb5   : > { %968 = vmatprep.mubr.bf16.mxu0 %v2509_v62  ;;  %1102 = vmatpush1.bf16.msra.mxu0 %v3092_v41  ;;  %v2573_v41 = vld [vmem:[%s3042_s9 + $0x80] ss:$12 sps:$4 sm:$0xff]   ;;  %s2804_s9 = scalar_lea.vmem %s2803_s6, 8192 }
  0xb6   : > { %1103 = vmatprep.subr.bf16.mxu0 %v3095_v42  ;;  %2237 = vmatprep.subr.bf16.mxu1 %v2580_v39  ;;  %v2582_v42 = vld [vmem:[#allocation7 + $0x58] sm:$0xff]   ;;  %p2806_p12 = scmp.lt.s32.totalorder %s2804_s9, %s2798_s27 }
  0xb8   : > { %2238 = vmatpush3.bf16.msra.mxu1 %v2581_v40  ;;  %p2807_p3 = por %p2806_p12, %p2805_p6 }
  0xb9   : > { %1104 = vmatpush1.bf16.msra.mxu0 %v3098_v44  ;;  %2239 = vmatprep.subr.bf16.mxu1 %v2582_v42  ;;  %v2584_v44 = vld [vmem:[#allocation7 + $0x50] sm:$0xff]  }
  0xba   : > { %1252 = vmatmul.mubr.bf16.gmra.mxu1 %v2559_v6  ;;  %p2808_p9 = pnand %p2807_p3, %p2801_p2 }
  0xbb   : > { %1261 = vmatprep.mubr.bf16.mxu1 %v2877_v0 }
  0xbc   : > { %969 = vmatmul.mubr.bf16.gmra.mxu0 %v2512_v1  ;;  %2240 = vmatpush3.bf16.msra.mxu1 %v2583_v43 }
  0xbd   : > { %978 = vmatprep.mubr.bf16.mxu0 %v2518_v2  ;;  %2241 = vmatprep.subr.bf16.mxu1 %v2584_v44 }
  0xc0   : > { %2242 = vmatpush3.bf16.msra.mxu1 %v2585_v45 }
  0xc2   : > { %1262 = vmatmul.mubr.bf16.gmra.mxu1 %v2563_v9 }
  0xc3   : > { %1271 = vmatprep.mubr.bf16.mxu1 %v2877_v0 }
  0xc4   : > { %979 = vmatmul.mubr.bf16.gmra.mxu0 %v2521_v4 }
  0xc5   : > { %988 = vmatprep.mubr.bf16.mxu0 %v2527_v5 }
  0xca   : > { %1272 = vmatmul.mubr.bf16.gmra.mxu1 %v2567_v12 }
  0xcc   : > { %989 = vmatmul.mubr.bf16.gmra.mxu0 %v2530_v7 }
  0xcd   : > { %998 = vmatprep.mubr.bf16.mxu0 %v2532_v8 }
  0xd4   : > { %999 = vmatmul.mubr.bf16.gmra.mxu0 %v2534_v10 }
  0xd5   : > { %1008 = vmatprep.mubr.bf16.mxu0 %v2536_v11 }
  0xdc   : > { %1009 = vmatmul.mubr.bf16.gmra.mxu0 %v2538_v13 }
  0xdd   : > { %1018 = vmatprep.mubr.bf16.mxu0 %v2540_v14 }
  0xe4   : > { %1019 = vmatmul.mubr.bf16.gmra.mxu0 %v2542_v15 }
  0xe5   : > { %1028 = vmatprep.mubr.bf16.mxu0 %v2544_v16 }
  0xec   : > { %1029 = vmatmul.mubr.bf16.gmra.mxu0 %v2546_v17 }
  0xed   : > { %1038 = vmatprep.mubr.bf16.mxu0 %v2548_v18 }
  0xf4   : > { %1039 = vmatmul.mubr.bf16.gmra.mxu0 %v2550_v19 }
  0xf5   : > { %1048 = vmatprep.mubr.bf16.mxu0 %v2552_v20 }
  0xfc   : > { %1049 = vmatmul.mubr.bf16.gmra.mxu0 %v2554_v21  ;;  %v390_v21 = vlaneseq }
  0xfd   : > { %1058 = vmatprep.mubr.bf16.mxu0 %v2556_v22 }
 0x104   : > { %1059 = vmatmul.mubr.bf16.gmra.mxu0 %v2558_v23 }
 0x105   : > { %1068 = vmatprep.mubr.bf16.mxu0 %v2560_v24 }
 0x10c   : > { %1069 = vmatmul.mubr.bf16.gmra.mxu0 %v2562_v25  ;;  %v391_v25 = vshrl.u32 %v390_v21, 7 }
 0x10d   : > { %1078 = vmatprep.mubr.bf16.mxu0 %v2564_v26 }
 0x10e   : > { %v392_v29 = vsub.s32 0, %v391_v25 }
 0x114   : > { %1079 = vmatmul.mubr.bf16.gmra.mxu0 %v2566_v27 }
 0x115   : > { %1121 = vmatprep.mubr.bf16.mxu0 %v2877_v0 }
 0x11c   : > { %1122 = vmatmul.mubr.bf16.vlgmr.msra.gmra.mxu0 %v2568_v28 }
 0x11d   : > { %1131 = vmatprep.mubr.bf16.mxu0 %v2877_v0 }
 0x124   : > { %1132 = vmatmul.mubr.bf16.gmra.mxu0 %v2569_v31 }
 0x125   : > { %1141 = vmatprep.mubr.bf16.mxu0 %v2877_v0 }
 0x12c   : > { %1142 = vmatmul.mubr.bf16.gmra.mxu0 %v2570_v32  ;;  %v396_v32 = vsub.s32 1, %v391_v25 }
 0x12d   : > { %1151 = vmatprep.mubr.bf16.mxu0 %v2877_v0 }
 0x12e   : > { %v3273_v37 = vrot.slane %v388_v30, %v396_v32 }
 0x134   : > { %1152 = vmatmul.mubr.bf16.gmra.mxu0 %v2571_v35  ;;  %v3271_v35 = vrot.slane %v388_v30, %v392_v29 }
 0x135   : > { %1161 = vmatprep.mubr.bf16.mxu0 %v2877_v0 }
 0x13c   : > { %1162 = vmatmul.mubr.bf16.gmra.mxu0 %v2572_v38 }
 0x13d   : > { %1171 = vmatprep.mubr.bf16.mxu0 %v2877_v0  ;;  %v2586_v0 = vld [vmem:[#allocation7 + $0x48] sm:$0xff]  }
 0x13e   : > { %2243 = vmatprep.subr.bf16.mxu1 %v2586_v0 }
 0x13f   : > { %2244 = vmatpush3.bf16.msra.mxu1 %v2587_v50 }
 0x140   : > { %2245 = vmatprep.subr.bf16.mxu1 %v2588_v61 }
 0x142   : > { %v3180_v46 = vpop.f32.mrf.mxu1 }
 0x143   : > { %2246 = vmatpush3.bf16.msra.mxu1 %v2589_v63 }
 0x144   : > { %1172 = vmatmul.mubr.bf16.gmra.mxu0 %v2573_v41  ;;  %v3182_v47 = vpop.f32.mrf.mxu1 }
 0x146   : > { %v3184_v48 = vpop.f32.mrf.mxu1 }
 0x148   : > { %v3186_v49 = vpop.f32.mrf.mxu1 }
 0x14a   : > { %v3188_v51 = vpop.f32.mrf.mxu1 }
 0x14c   : > { %v3192_v53 = vpop.f32.mrf.mxu1 }
 0x14e   : > { %v3196_v55 = vpop.f32.mrf.mxu1 }
 0x150   : > { %v3200_v57 = vpop.f32.mrf.mxu1 }
 0x152   : > { %v3204_v59 = vpop.f32.mrf.mxu1 }
 0x154   : > { %v3208_v62 = vpop.f32.mrf.mxu1 }
 0x156   : > { %v3212_v2 = vpop.f32.mrf.mxu1 }
 0x158   : > { %v3218_v5 = vpop.f32.mrf.mxu1 }
 0x15a   : > { %v3224_v8 = vpop.f32.mrf.mxu1 }
 0x15c   : > { %v3190_v52 = vpop.f32.mrf.mxu0  ;;  %v3230_v11 = vpop.f32.mrf.mxu1 }
 0x15e   : > { %v3194_v54 = vpop.f32.mrf.mxu0  ;;  %v3236_v14 = vpop.f32.mrf.mxu1 }
 0x160   : > { %v3198_v56 = vpop.f32.mrf.mxu0  ;;  %v3242_v17 = vpop.f32.mrf.mxu1 }
 0x162   : > { %v3202_v58 = vpop.f32.mrf.mxu0  ;;  %v3248_v20 = vpop.f32.mrf.mxu1 }
 0x164   : > { %v3206_v60 = vpop.f32.mrf.mxu0  ;;  %v3254_v24 = vpop.f32.mrf.mxu1 }
 0x166   : > { %v3210_v1 = vpop.f32.mrf.mxu0  ;;  %v3260_v28 = vpop.f32.mrf.mxu1 }
 0x168   : > { %v3214_v3 = vpop.f32.mrf.mxu0  ;;  %v3269_v34 = vpop.f32.mrf.mxu1 }
 0x16a   : > { %v3216_v4 = vpop.f32.mrf.mxu0  ;;  %v3276_v40 = vpop.f32.mrf.mxu1 }
 0x16c   : > { %v3220_v6 = vpop.f32.mrf.mxu0  ;;  %v3281_v0 = vpop.f32.mrf.mxu1 }
 0x16e   : > { %v3222_v7 = vpop.f32.mrf.mxu0 }
 0x170   : > { %v3226_v9 = vpop.f32.mrf.mxu0 }
 0x172   : > { %v3228_v10 = vpop.f32.mrf.mxu0 }
 0x174   : > { %v3232_v12 = vpop.f32.mrf.mxu0 }
 0x176   : > { %v3234_v13 = vpop.f32.mrf.mxu0 }
 0x178   : > { %v3238_v15 = vpop.f32.mrf.mxu0 }
 0x17a   : > { %v3240_v16 = vpop.f32.mrf.mxu0 }
 0x17c   : > { %v3244_v18 = vpop.f32.mrf.mxu0 }
 0x17e   : > { %v3246_v19 = vpop.f32.mrf.mxu0 }
 0x180   : > { %v3250_v22 = vpop.f32.mrf.mxu0 }
 0x182   : > { %v3252_v23 = vpop.f32.mrf.mxu0 }
 0x184   : > { %v3256_v26 = vpop.f32.mrf.mxu0 }
 0x186   : > { %v3258_v27 = vpop.f32.mrf.mxu0 }
 0x188   : > { %v3265_v31 = vpop.f32.mrf.mxu0 }
 0x18a   : > { %v3267_v33 = vpop.f32.mrf.mxu0 }
 0x18c   : > { %v990_v36 = vpop.f32.mrf.mxu0 }
 0x18d   : > { %v991_v38 = vadd.f32 %v990_v36, %v3271_v35 }
 0x18e   : > { %v992_v39 = vpop.f32.mrf.mxu0 }
 0x18f   : > { %v993_v41 = vadd.f32 %v992_v39, %v3273_v37  ;;  %v1184_v43 = vadd.f32 %v3180_v46, %v991_v38  ;;  %v3288_v46 = vpop.f32.mrf.mxu1 }
 0x190   : > { %v994_v42 = vpop.f32.mrf.mxu0 }
 0x191   : > { %v995_v44 = vadd.f32 %v994_v42, %v3271_v35  ;;  %v1186_v50 = vadd.f32 %v3182_v47, %v993_v41  ;;  %v1306_v25 = vmax.f32 %v1184_v43, 0.0 }
 0x192   : > { %v996_v45 = vpop.f32.mrf.mxu0 }
 0x193   : > { %v997_v61 = vadd.f32 %v996_v45, %v3273_v37  ;;  %v1188_v63 = vadd.f32 %v3184_v48, %v995_v44  ;;  %v1307_v38 = vmax.f32 %v1186_v50, 0.0 }
 0x194   : > { %v1000_v21 = vpop.f32.mrf.mxu0 }
 0x195   : > { %v1308_v29 = vmax.f32 %v1188_v63, 0.0  ;;  %v1001_v30 = vadd.f32 %v1000_v21, %v3271_v35  ;;  %v1190_v32 = vadd.f32 %v3186_v49, %v997_v61  ;;  %v3297_v63 = vpop.f32.mrf.mxu1 }
 0x196   : > { %v1002_v36 = vpop.f32.mrf.mxu0 }
 0x197   : > { %v3290_v39 = vpack.c.bf16 %v1308_v29, %v1306_v25  ;;  %v1309_v42 = vmax.f32 %v1190_v32, 0.0  ;;  %v1003_v47 = vadd.f32 %v1002_v36, %v3273_v37  ;;  %v1194_v48 = vadd.f32 %v3188_v51, %v1001_v30  ;;  %v3304_v51 = vpop.f32.mrf.mxu1 }
 0x198   : > { %v1004_v41 = vpop.f32.mrf.mxu0 }
 0x199   : > { %v3293_v45 = vpack.c.bf16 %v1309_v42, %v1307_v38  ;;  %v1005_v43 = vadd.f32 %v1004_v41, %v3271_v35  ;;  %v1196_v49 = vadd.f32 %v3192_v53, %v1003_v47  ;;  %v1310_v25 = vmax.f32 %v1194_v48, 0.0 }
 0x19a   : > { %v1006_v44 = vpop.f32.mrf.mxu0 }
 0x19b   : > { %v1007_v61 = vadd.f32 %v1006_v44, %v3273_v37  ;;  %v1198_v50 = vadd.f32 %v3196_v55, %v1005_v43  ;;  %v1311_v30 = vmax.f32 %v1196_v49, 0.0 }
 0x19c   : > { %v1010_v21 = vpop.f32.mrf.mxu0 }
 0x19d   : > { %v1312_v29 = vmax.f32 %v1198_v50, 0.0  ;;  %v1011_v32 = vadd.f32 %v1010_v21, %v3271_v35  ;;  %v1200_v36 = vadd.f32 %v3200_v57, %v1007_v61  ;;  %v3313_v50 = vpop.f32.mrf.mxu1 }
 0x19e   : > { %v1012_v38 = vpop.f32.mrf.mxu0 }
 0x19f   : > { %v3306_v42 = vpack.c.bf16 %v1312_v29, %v1310_v25  ;;  %v1313_v41 = vmax.f32 %v1200_v36, 0.0  ;;  %v1013_v53 = vadd.f32 %v1012_v38, %v3273_v37  ;;  %v1204_v55 = vadd.f32 %v3204_v59, %v1011_v32  ;;  %v3320_v59 = vpop.f32.mrf.mxu1 }
 0x1a0   : > { %v1014_v47 = vpop.f32.mrf.mxu0 }
 0x1a1   : > { %v3309_v44 = vpack.c.bf16 %v1313_v41, %v1311_v30  ;;  %v1015_v48 = vadd.f32 %v1014_v47, %v3271_v35  ;;  %v1206_v57 = vadd.f32 %v3208_v62, %v1013_v53  ;;  %v1314_v25 = vmax.f32 %v1204_v55, 0.0 }
 0x1a2   : > { %v1016_v43 = vpop.f32.mrf.mxu0 }
 0x1a3   : > { %v1017_v61 = vadd.f32 %v1016_v43, %v3273_v37  ;;  %v1208_v49 = vadd.f32 %v3212_v2, %v1015_v48  ;;  %v1315_v32 = vmax.f32 %v1206_v57, 0.0 }
 0x1a4   : > { %v1020_v21 = vpop.f32.mrf.mxu0 }
 0x1a5   : > { %v1316_v29 = vmax.f32 %v1208_v49, 0.0  ;;  %v1021_v36 = vadd.f32 %v1020_v21, %v3271_v35  ;;  %v1210_v38 = vadd.f32 %v3218_v5, %v1017_v61  ;;  %v3329_v49 = vpop.f32.mrf.mxu1 }
 0x1a6   : > { %v1022_v30 = vpop.f32.mrf.mxu0 }
 0x1a7   : > { %v3322_v41 = vpack.c.bf16 %v1316_v29, %v1314_v25  ;;  %v1317_v47 = vmax.f32 %v1210_v38, 0.0  ;;  %v1023_v62 = vadd.f32 %v1022_v30, %v3273_v37  ;;  %v1214_v2 = vadd.f32 %v3224_v8, %v1021_v36  ;;  %v3336_v8 = vpop.f32.mrf.mxu1 }
 0x1a8   : > { %v1024_v53 = vpop.f32.mrf.mxu0 }
 0x1a9   : > { %v3325_v43 = vpack.c.bf16 %v1317_v47, %v1315_v32  ;;  %v1025_v55 = vadd.f32 %v1024_v53, %v3271_v35  ;;  %v1216_v5 = vadd.f32 %v3230_v11, %v1023_v62  ;;  %v1318_v25 = vmax.f32 %v1214_v2, 0.0 }
 0x1aa   : > { %v1026_v48 = vpop.f32.mrf.mxu0 }
 0x1ab   : > { %v1027_v61 = vadd.f32 %v1026_v48, %v3273_v37  ;;  %v1218_v57 = vadd.f32 %v3236_v14, %v1025_v55  ;;  %v1319_v36 = vmax.f32 %v1216_v5, 0.0 }
 0x1ac   : > { %v1030_v21 = vpop.f32.mrf.mxu0 }
 0x1ad   : > { %v1320_v29 = vmax.f32 %v1218_v57, 0.0  ;;  %v1031_v38 = vadd.f32 %v1030_v21, %v3271_v35  ;;  %v1220_v30 = vadd.f32 %v3242_v17, %v1027_v61  ;;  %v1255_v57 = vpop.f32.mrf.mxu1 }
 0x1ae   : > { %v1032_v32 = vpop.f32.mrf.mxu0 }
 0x1af   : > { %v3338_v47 = vpack.c.bf16 %v1320_v29, %v1318_v25  ;;  %v1321_v53 = vmax.f32 %v1220_v30, 0.0  ;;  %v1033_v11 = vadd.f32 %v1032_v32, %v3273_v37  ;;  %v1224_v14 = vadd.f32 %v3248_v20, %v1031_v38 }
 0x1b0   : > { %v1034_v62 = vpop.f32.mrf.mxu0 }
 0x1b1   : > { %3869 = vst [vmem:[#allocation12_spill] sm:$0xff] %v3338_v47  ;;  %v3341_v48 = vpack.c.bf16 %v1321_v53, %v1319_v36  ;;  %v1035_v2 = vadd.f32 %v1034_v62, %v3271_v35  ;;  %v1226_v17 = vadd.f32 %v3254_v24, %v1033_v11  ;;  %v1322_v25 = vmax.f32 %v1224_v14, 0.0  ;;  %v1257_v53 = vpop.f32.mrf.mxu1 }
 0x1b2   : > { %v1036_v55 = vpop.f32.mrf.mxu0 }
 0x1b3   : > { %v1037_v61 = vadd.f32 %v1036_v55, %v3273_v37  ;;  %v1228_v5 = vadd.f32 %v3260_v28, %v1035_v2  ;;  %v1323_v20 = vmax.f32 %v1226_v17, 0.0  ;;  %v1259_v55 = vpop.f32.mrf.mxu1 }
 0x1b4   : > { %v1040_v21 = vpop.f32.mrf.mxu0 }
 0x1b5   : > { %v1324_v29 = vmax.f32 %v1228_v5, 0.0  ;;  %v1041_v30 = vadd.f32 %v1040_v21, %v3271_v35  ;;  %v1230_v32 = vadd.f32 %v3269_v34, %v1037_v61 }
 0x1b6   : > { %v1042_v36 = vpop.f32.mrf.mxu0 }
 0x1b7   : > { %v3350_v38 = vpack.c.bf16 %v1324_v29, %v1322_v25  ;;  %v1325_v62 = vmax.f32 %v1230_v32, 0.0  ;;  %v1043_v47 = vadd.f32 %v1042_v36, %v3273_v37  ;;  %v1234_v28 = vadd.f32 %v3276_v40, %v1041_v30 }
 0x1b8   : > { %v1044_v24 = vpop.f32.mrf.mxu0 }
 0x1b9   : > { %v3353_v11 = vpack.c.bf16 %v1325_v62, %v1323_v20  ;;  %v1045_v14 = vadd.f32 %v1044_v24, %v3271_v35  ;;  %v1236_v5 = vadd.f32 %v3281_v0, %v1043_v47  ;;  %v1326_v21 = vmax.f32 %v1234_v28, 0.0  ;;  %v1263_v20 = vpop.f32.mrf.mxu1 }
 0x1ba   : > { %v1046_v2 = vpop.f32.mrf.mxu0 }
 0x1bb   : > { %v1047_v34 = vadd.f32 %v1046_v2, %v3273_v37  ;;  %v1238_v17 = vadd.f32 %v3288_v46, %v1045_v14  ;;  %v1327_v40 = vmax.f32 %v1236_v5, 0.0  ;;  %v1265_v2 = vpop.f32.mrf.mxu1 }
 0x1bc   : > { %v1050_v61 = vpop.f32.mrf.mxu0 }
 0x1bd   : > { %v1328_v25 = vmax.f32 %v1238_v17, 0.0  ;;  %v1051_v29 = vadd.f32 %v1050_v61, %v3271_v35  ;;  %v1240_v32 = vadd.f32 %v3297_v63, %v1047_v34 }
 0x1be   : > { %v1052_v36 = vpop.f32.mrf.mxu0 }
 0x1bf   : > { %v3362_v30 = vpack.c.bf16 %v1328_v25, %v1326_v21  ;;  %v1329_v62 = vmax.f32 %v1240_v32, 0.0  ;;  %v1053_v24 = vadd.f32 %v1052_v36, %v3273_v37  ;;  %v1244_v46 = vadd.f32 %v3304_v51, %v1051_v29 }
 0x1c0   : > { %v1054_v0 = vpop.f32.mrf.mxu0 }
 0x1c1   : > { %v3365_v47 = vpack.c.bf16 %v1329_v62, %v1327_v40  ;;  %v1055_v28 = vadd.f32 %v1054_v0, %v3271_v35  ;;  %v1246_v17 = vadd.f32 %v3313_v50, %v1053_v24  ;;  %v1330_v61 = vmax.f32 %v1244_v46, 0.0  ;;  %v1267_v40 = vpop.f32.mrf.mxu1 }
 0x1c2   : > { %v1056_v14 = vpop.f32.mrf.mxu0 }
 0x1c3   : > { %v1057_v63 = vadd.f32 %v1056_v14, %v3273_v37  ;;  %v1248_v5 = vadd.f32 %v3320_v59, %v1055_v28  ;;  %v1331_v51 = vmax.f32 %v1246_v17, 0.0  ;;  %v1269_v14 = vpop.f32.mrf.mxu1 }
 0x1c4   : > { %v1060_v34 = vpop.f32.mrf.mxu0 }
 0x1c5   : > { %v1332_v21 = vmax.f32 %v1248_v5, 0.0  ;;  %v1061_v25 = vadd.f32 %v1060_v34, %v3271_v35  ;;  %v1250_v32 = vadd.f32 %v3329_v49, %v1057_v63 }
 0x1c6   : > { %v1062_v36 = vpop.f32.mrf.mxu0 }
 0x1c7   : > { %v3374_v29 = vpack.c.bf16 %v1332_v21, %v1330_v61  ;;  %v1333_v62 = vmax.f32 %v1250_v32, 0.0  ;;  %v1063_v0 = vadd.f32 %v1062_v36, %v3273_v37  ;;  %v1254_v59 = vadd.f32 %v3336_v8, %v1061_v25 }
 0x1c8   : > { %v1064_v50 = vpop.f32.mrf.mxu0 }
 0x1c9   : > { %3870 = vst [vmem:[#allocation13_spill] sm:$0xff] %v3374_v29  ;;  %v3377_v24 = vpack.c.bf16 %v1333_v62, %v1331_v51  ;;  %v1065_v46 = vadd.f32 %v1064_v50, %v3271_v35  ;;  %v1256_v5 = vadd.f32 %v1255_v57, %v1063_v0  ;;  %v1334_v17 = vmax.f32 %v1254_v59, 0.0  ;;  %v1273_v29 = vpop.f32.mrf.mxu1 }
 0x1ca   : > { %v1066_v28 = vpop.f32.mrf.mxu0 }
 0x1cb   : > { %3871 = vst [vmem:[#allocation14_spill] sm:$0xff] %v3377_v24  ;;  %v1067_v49 = vadd.f32 %v1066_v28, %v3273_v37  ;;  %v1258_v63 = vadd.f32 %v1257_v53, %v1065_v46  ;;  %v1335_v51 = vmax.f32 %v1256_v5, 0.0  ;;  %v1275_v59 = vpop.f32.mrf.mxu1 }
 0x1cc   : > { %v1070_v34 = vpop.f32.mrf.mxu0 }
 0x1cd   : > { %v1336_v61 = vmax.f32 %v1258_v63, 0.0  ;;  %v1071_v21 = vadd.f32 %v1070_v34, %v3271_v35  ;;  %v1260_v32 = vadd.f32 %v1259_v55, %v1067_v49 }
 0x1ce   : > { %v1072_v36 = vpop.f32.mrf.mxu0 }
 0x1cf   : > { %v3383_v62 = vpack.c.bf16 %v1336_v61, %v1334_v17  ;;  %v1337_v8 = vmax.f32 %v1260_v32, 0.0  ;;  %v1073_v25 = vadd.f32 %v1072_v36, %v3273_v37  ;;  %v1264_v57 = vadd.f32 %v1263_v20, %v1071_v21  ;;  %v1277_v32 = vpop.f32.mrf.mxu1 }
 0x1d0   : > { %v1074_v50 = vpop.f32.mrf.mxu0 }
 0x1d1   : > { %v3386_v24 = vpack.c.bf16 %v1337_v8, %v1335_v51  ;;  %v1075_v53 = vadd.f32 %v1074_v50, %v3271_v35  ;;  %v1266_v46 = vadd.f32 %v1265_v2, %v1073_v25  ;;  %v1338_v63 = vmax.f32 %v1264_v57, 0.0  ;;  %v1279_v57 = vpop.f32.mrf.mxu1 }
 0x1d2   : > { %v1076_v0 = vpop.f32.mrf.mxu0 }
 0x1d3   : > { %v1077_v28 = vadd.f32 %v1076_v0, %v3273_v37  ;;  %v1268_v55 = vadd.f32 %v1267_v40, %v1075_v53  ;;  %v1339_v36 = vmax.f32 %v1266_v46, 0.0  ;;  %v931_v46 = vadd.f32 %v3190_v52, %v3271_v35 }
 0x1d4   : > { %v1080_v49 = vpop.f32.mrf.mxu0 }
 0x1d5   : > { %v1340_v5 = vmax.f32 %v1268_v55, 0.0  ;;  %v1081_v34 = vadd.f32 %v1080_v49, %v3271_v35  ;;  %v1270_v17 = vadd.f32 %v1269_v14, %v1077_v28 }
 0x1d6   : > { %v1082_v61 = vpop.f32.mrf.mxu0 }
 0x1d7   : > { %v3391_v51 = vpack.c.bf16 %v1340_v5, %v1338_v63  ;;  %v1341_v20 = vmax.f32 %v1270_v17, 0.0  ;;  %v1083_v21 = vadd.f32 %v1082_v61, %v3273_v37  ;;  %v1274_v2 = vadd.f32 %v1273_v29, %v1081_v34 }
 0x1d8   : > { %v1084_v8 = vpop.f32.mrf.mxu0  ;;  %v933_v5 = vadd.f32 %v3194_v54, %v3273_v37  ;;  %v935_v29 = vadd.f32 %v3198_v56, %v3271_v35  ;;  %v941_v56 = vadd.f32 %v3206_v60, %v3271_v35 }
 0x1d9   : > { %v3394_v50 = vpack.c.bf16 %v1341_v20, %v1339_v36  ;;  %v1085_v40 = vadd.f32 %v1084_v8, %v3271_v35  ;;  %v1276_v53 = vadd.f32 %v1275_v59, %v1083_v21  ;;  %v1342_v55 = vmax.f32 %v1274_v2, 0.0 }
 0x1da   : > { %v1086_v25 = vpop.f32.mrf.mxu0  ;;  %v937_v20 = vadd.f32 %v3202_v58, %v3273_v37  ;;  %v945_v58 = vadd.f32 %v3214_v3, %v3271_v35 }
 0x1db   : > { %v1087_v0 = vadd.f32 %v1086_v25, %v3273_v37  ;;  %v1278_v14 = vadd.f32 %v1277_v32, %v1085_v40  ;;  %v1343_v17 = vmax.f32 %v1276_v53, 0.0 }
 0x1dc   : > { %v1123_v28 = vpop.f32.mrf.mxu0 }
 0x1dd   : > { %v1344_v49 = vmax.f32 %v1278_v14, 0.0  ;;  %v1280_v63 = vadd.f32 %v1279_v57, %v1087_v0  ;;  %v1124_v59 = vadd.f32 %v1123_v28, %v931_v46  ;;  %v943_v46 = vadd.f32 %v3210_v1, %v3273_v37 }
 0x1de   : > { %v1125_v34 = vpop.f32.mrf.mxu0  ;;  %v951_v1 = vadd.f32 %v3220_v6, %v3271_v35 }
 0x1df   : > { %v3404_v61 = vpack.c.bf16 %v1344_v49, %v1342_v55  ;;  %v1345_v36 = vmax.f32 %v1280_v63, 0.0  ;;  %v1126_v21 = vadd.f32 %v1125_v34, %v933_v5  ;;  %v1282_v40 = vmax.f32 %v1124_v59, 0.0 }
 0x1e0   : > { %v1127_v32 = vpop.f32.mrf.mxu0  ;;  %v947_v5 = vadd.f32 %v3216_v4, %v3273_v37  ;;  %v955_v4 = vadd.f32 %v3226_v9, %v3271_v35 }
 0x1e1   : > { %v3408_v52 = vpack.c.bf16 %v1345_v36, %v1343_v17  ;;  %v1128_v8 = vadd.f32 %v1127_v32, %v935_v29  ;;  %v1283_v53 = vmax.f32 %v1126_v21, 0.0 }
 0x1e2   : > { %v1129_v2 = vpop.f32.mrf.mxu0 }
 0x1e3   : > { %v1284_v54 = vmax.f32 %v1128_v8, 0.0  ;;  %v1130_v25 = vadd.f32 %v1129_v2, %v937_v20  ;;  %v953_v2 = vadd.f32 %v3222_v7, %v3273_v37  ;;  %v961_v7 = vadd.f32 %v3232_v12, %v3271_v35 }
 0x1e4   : > { %v1133_v57 = vpop.f32.mrf.mxu0 }
 0x1e5   : > { %v1346_v0 = vpack.c.bf16 %v1284_v54, %v1282_v40  ;;  %v1285_v14 = vmax.f32 %v1130_v25, 0.0  ;;  %v1134_v49 = vadd.f32 %v1133_v57, %v941_v56  ;;  %v957_v57 = vadd.f32 %v3228_v10, %v3273_v37 }
 0x1e6   : > { %v1135_v28 = vpop.f32.mrf.mxu0  ;;  %v965_v10 = vadd.f32 %v3238_v15, %v3271_v35 }
 0x1e7   : > { %v1347_v55 = vpack.c.bf16 %v1285_v14, %v1283_v53  ;;  %v1136_v29 = vadd.f32 %v1135_v28, %v943_v46  ;;  %v1286_v17 = vmax.f32 %v1134_v49, 0.0 }
 0x1e8   : > { %v1137_v63 = vpop.f32.mrf.mxu0 }
 0x1e9   : > { %v1138_v34 = vadd.f32 %v1137_v63, %v945_v58  ;;  %1545 = vmatprep.mubr.bf16.mxu1 %v1347_v55  ;;  %v1287_v20 = vmax.f32 %v1136_v29, 0.0  ;;  %v963_v63 = vadd.f32 %v3234_v13, %v3273_v37  ;;  %v971_v13 = vadd.f32 %v3244_v18, %v3271_v35 }
 0x1ea   : > { %v1139_v60 = vpop.f32.mrf.mxu0  ;;  %1546 = vmatmul.mubr.bf16.vlgmr.msra.gmra.mxu1 %v1346_v0 }
 0x1eb   : > { %v1288_v59 = vmax.f32 %v1138_v34, 0.0  ;;  %v1140_v36 = vadd.f32 %v1139_v60, %v947_v5  ;;  %v967_v60 = vadd.f32 %v3240_v16, %v3273_v37  ;;  %v975_v16 = vadd.f32 %v3250_v22, %v3271_v35 }
 0x1ec   : > { %v1143_v32 = vpop.f32.mrf.mxu0 }
 0x1ed   : > { %v1348_v3 = vpack.c.bf16 %v1288_v59, %v1286_v17  ;;  %v1289_v21 = vmax.f32 %v1140_v36, 0.0  ;;  %v1144_v54 = vadd.f32 %v1143_v32, %v951_v1 }
 0x1ee   : > { %v1145_v8 = vpop.f32.mrf.mxu0 }
 0x1ef   : > { %v1349_v40 = vpack.c.bf16 %v1289_v21, %v1287_v20  ;;  %v1146_v56 = vadd.f32 %v1145_v8, %v953_v2  ;;  %v1290_v0 = vmax.f32 %v1144_v54, 0.0  ;;  %v973_v2 = vadd.f32 %v3246_v19, %v3273_v37 }
 0x1f0   : > { %v1147_v25 = vpop.f32.mrf.mxu0  ;;  %v981_v19 = vadd.f32 %v3256_v26, %v3271_v35 }
 0x1f1   : > { %v1148_v53 = vadd.f32 %v1147_v25, %v955_v4  ;;  %1553 = vmatprep.mubr.bf16.mxu1 %v1349_v40  ;;  %v1291_v58 = vmax.f32 %v1146_v56, 0.0  ;;  %v977_v25 = vadd.f32 %v3252_v23, %v3273_v37  ;;  %v985_v23 = vadd.f32 %v3265_v31, %v3271_v35  ;;  %v3872_v31 = vld [vmem:[#allocation12_spill] sm:$0xff]  ;;  %v3874_v35 = vld [vmem:[#allocation13_spill] sm:$0xff] }
 0x1f2   : > { %v1149_v6 = vpop.f32.mrf.mxu0  ;;  %1554 = vmatmul.mubr.bf16.gmra.mxu1 %v1348_v3 }
 0x1f3   : > { %v1292_v14 = vmax.f32 %v1148_v53, 0.0  ;;  %v1150_v28 = vadd.f32 %v1149_v6, %v957_v57 }
 0x1f4   : > { %v1153_v46 = vpop.f32.mrf.mxu0 }
 0x1f5   : > { %v1350_v9 = vpack.c.bf16 %v1292_v14, %v1290_v0  ;;  %v1293_v55 = vmax.f32 %v1150_v28, 0.0  ;;  %v1154_v29 = vadd.f32 %v1153_v46, %v961_v7 }
 0x1f6   : > { %v1155_v49 = vpop.f32.mrf.mxu0 }
 0x1f7   : > { %v1351_v5 = vpack.c.bf16 %v1293_v55, %v1291_v58  ;;  %v1156_v17 = vadd.f32 %v1155_v49, %v963_v63  ;;  %v1294_v36 = vmax.f32 %v1154_v29, 0.0  ;;  %v983_v58 = vadd.f32 %v3258_v27, %v3273_v37 }
 0x1f8   : > { %v1157_v34 = vpop.f32.mrf.mxu0  ;;  %v987_v63 = vadd.f32 %v3267_v33, %v3273_v37  ;;  %v3873_v33 = vld [vmem:[#allocation14_spill] sm:$0xff] }
 0x1f9   : > { %v1158_v59 = vadd.f32 %v1157_v34, %v965_v10  ;;  %1561 = vmatprep.mubr.bf16.mxu1 %v1351_v5  ;;  %v1295_v3 = vmax.f32 %v1156_v17, 0.0 }
 0x1fa   : > { %v1159_v12 = vpop.f32.mrf.mxu0  ;;  %1562 = vmatmul.mubr.bf16.gmra.mxu1 %v1350_v9 }
 0x1fb   : > { %v1296_v32 = vmax.f32 %v1158_v59, 0.0  ;;  %v1160_v1 = vadd.f32 %v1159_v12, %v967_v60 }
 0x1fc   : > { %v1163_v20 = vpop.f32.mrf.mxu0 }
 0x1fd   : > { %v1352_v15 = vpack.c.bf16 %v1296_v32, %v1294_v36  ;;  %v1297_v21 = vmax.f32 %v1160_v1, 0.0  ;;  %v1164_v40 = vadd.f32 %v1163_v20, %v971_v13 }
 0x1fe   : > { %v1165_v8 = vpop.f32.mrf.mxu0 }
 0x1ff   : > { %v1353_v4 = vpack.c.bf16 %v1297_v21, %v1295_v3  ;;  %v1166_v57 = vadd.f32 %v1165_v8, %v973_v2  ;;  %v1298_v53 = vmax.f32 %v1164_v40, 0.0 }
 0x200   : > { %v1167_v54 = vpop.f32.mrf.mxu0 }
 0x201   : > { %v1168_v56 = vadd.f32 %v1167_v54, %v975_v16  ;;  %1569 = vmatprep.mubr.bf16.mxu1 %v1353_v4  ;;  %v1299_v28 = vmax.f32 %v1166_v57, 0.0 }
 0x202   : > { %v1169_v18 = vpop.f32.mrf.mxu0  ;;  %1570 = vmatmul.mubr.bf16.gmra.mxu1 %v1352_v15 }
 0x203   : > { %v1300_v6 = vmax.f32 %v1168_v56, 0.0  ;;  %v1170_v0 = vadd.f32 %v1169_v18, %v977_v25 }
 0x204   : > { %v1173_v14 = vpop.f32.mrf.mxu0 }
 0x205   : > { %v1354_v22 = vpack.c.bf16 %v1300_v6, %v1298_v53  ;;  %v1301_v46 = vmax.f32 %v1170_v0, 0.0  ;;  %v1174_v55 = vadd.f32 %v1173_v14, %v981_v19 }
 0x206   : > { %v1175_v7 = vpop.f32.mrf.mxu0 }
 0x207   : > { %v1355_v9 = vpack.c.bf16 %v1301_v46, %v1299_v28  ;;  %v1176_v10 = vadd.f32 %v1175_v7, %v983_v58  ;;  %v1302_v29 = vmax.f32 %v1174_v55, 0.0 }
 0x208   : > { %v1177_v49 = vpop.f32.mrf.mxu0 }
 0x209   : > { %v1178_v5 = vadd.f32 %v1177_v49, %v985_v23  ;;  %1577 = vmatprep.mubr.bf16.mxu1 %v1355_v9  ;;  %v1303_v17 = vmax.f32 %v1176_v10, 0.0 }
 0x20a   : > { %v1179_v26 = vpop.f32.mrf.mxu0  ;;  %1578 = vmatmul.mubr.bf16.gmra.mxu1 %v1354_v22 }
 0x20b   : > { %v1304_v34 = vmax.f32 %v1178_v5, 0.0  ;;  %v1180_v60 = vadd.f32 %v1179_v26, %v987_v63 }
 0x20d   : > { %v1356_v59 = vpack.c.bf16 %v1304_v34, %v1302_v29  ;;  %v1305_v27 = vmax.f32 %v1180_v60, 0.0 }
 0x20f   : > { %v1357_v12 = vpack.c.bf16 %v1305_v27, %v1303_v17 }
 0x211   : > { %1585 = vmatprep.mubr.bf16.mxu1 %v1357_v12 }
 0x212   : > { %1586 = vmatmul.mubr.bf16.gmra.mxu1 %v1356_v59 }
 0x213   : > { %1593 = vmatprep.mubr.bf16.mxu1 %v3293_v45  ;;  %v3473_v45 = vld [vmem:[%s3852_s4] ss:$0 sm:$0xff] }
 0x21a   : > { %1594 = vmatmul.mubr.bf16.gmra.mxu1 %v3290_v39 }
 0x21b   : > { %1601 = vmatprep.mubr.bf16.mxu1 %v3309_v44 }
 0x222   : > { %1602 = vmatmul.mubr.bf16.gmra.mxu1 %v3306_v42 }
 0x223   : > { %1609 = vmatprep.mubr.bf16.mxu1 %v3325_v43 }
 0x22a   : > { %1610 = vmatmul.mubr.bf16.gmra.mxu1 %v3322_v41 }
 0x22b   : > { %1617 = vmatprep.mubr.bf16.mxu1 %v3341_v48 }
 0x232   : > { %1618 = vmatmul.mubr.bf16.gmra.mxu1 %v3872_v31 }
 0x233   : > { %1625 = vmatprep.mubr.bf16.mxu1 %v3353_v11 }
 0x23a   : > { %1626 = vmatmul.mubr.bf16.gmra.mxu1 %v3350_v38 }
 0x23b   : > { %1633 = vmatprep.mubr.bf16.mxu1 %v3365_v47 }
 0x242   : > { %1634 = vmatmul.mubr.bf16.gmra.mxu1 %v3362_v30 }
 0x243   : > { %1641 = vmatprep.mubr.bf16.mxu1 %v3873_v33 }
 0x24a   : > { %1642 = vmatmul.mubr.bf16.gmra.mxu1 %v3874_v35 }
 0x24b   : > { %1649 = vmatprep.mubr.bf16.mxu1 %v3386_v24 }
 0x252   : > { %1650 = vmatmul.mubr.bf16.gmra.mxu1 %v3383_v62 }
 0x253   : > { %1657 = vmatprep.mubr.bf16.mxu1 %v3394_v50 }
 0x25a   : > { %1658 = vmatmul.mubr.bf16.gmra.mxu1 %v3391_v51 }
 0x25b   : > { %1665 = vmatprep.mubr.bf16.mxu1 %v3408_v52 }
 0x262   : > { %1666 = vmatmul.mubr.bf16.gmra.mxu1 %v3404_v61 }
 0x2aa   : > { %v2247_v37 = vpop.f32.mrf.mxu1 }
 0x2ac   : > { %v2248_v39 = vpop.f32.mrf.mxu1 }
 0x2ad   : > { %v2249_v42 = vadd.f32 %v2248_v39, %v2247_v37 }
 0x2ae   : > { %v2250_v44 = vpop.f32.mrf.mxu1 }
 0x2af   : > { %v3476_v41 = vadd.f32 %v2249_v42, %v3473_v45 }
 0x2b0   : > { %v2251_v43 = vpop.f32.mrf.mxu1 }
 0x2b1   : > { %v2252_v48 = vadd.f32 %v2251_v43, %v2250_v44  ;;  %1674 = vmax.xlane.f32.xlu0 %v3476_v41 }
 0x2b2   : > { %v2253_v38 = vpop.f32.mrf.mxu1 }
 0x2b3   : > { %v3480_v11 = vadd.f32 %v2252_v48, %v3473_v45 }
 0x2b4   : > { %v2254_v30 = vpop.f32.mrf.mxu1 }
 0x2b5   : > { %v2255_v47 = vadd.f32 %v2254_v30, %v2253_v38  ;;  %1676 = vmax.xlane.f32.xlu0 %v3480_v11 }
 0x2b6   : > { %v2256_v24 = vpop.f32.mrf.mxu1 }
 0x2b7   : > { %v3484_v62 = vadd.f32 %v2255_v47, %v3473_v45 }
 0x2b8   : > { %v2257_v51 = vpop.f32.mrf.mxu1 }
 0x2b9   : > { %v2258_v50 = vadd.f32 %v2257_v51, %v2256_v24  ;;  %1678 = vmax.xlane.f32.xlu1 %v3484_v62 }
 0x2ba   : > { %v2259_v61 = vpop.f32.mrf.mxu1 }
 0x2bb   : > { %v3488_v52 = vadd.f32 %v2258_v50, %v3473_v45 }
 0x2bc   : > { %v2260_v36 = vpop.f32.mrf.mxu1 }
 0x2bd   : > { %v2261_v32 = vadd.f32 %v2260_v36, %v2259_v61  ;;  %1680 = vmax.xlane.f32.xlu1 %v3488_v52 }
 0x2be   : > { %v2262_v1 = vpop.f32.mrf.mxu1 }
 0x2bf   : > { %v3492_v20 = vadd.f32 %v2261_v32, %v3473_v45 }
 0x2c0   : > { %v2263_v13 = vpop.f32.mrf.mxu1 }
 0x2c1   : > { %v2264_v3 = vadd.f32 %v2263_v13, %v2262_v1  ;;  %1682 = vmax.xlane.f32.xlu0 %v3492_v20 }
 0x2c2   : > { %v2265_v15 = vpop.f32.mrf.mxu1 }
 0x2c3   : > { %v3496_v21 = vadd.f32 %v2264_v3, %v3473_v45 }
 0x2c4   : > { %v2266_v8 = vpop.f32.mrf.mxu1 }
 0x2c5   : > { %v2267_v2 = vadd.f32 %v2266_v8, %v2265_v15  ;;  %1684 = vmax.xlane.f32.xlu1 %v3496_v21 }
 0x2c6   : > { %v2268_v16 = vpop.f32.mrf.mxu1 }
 0x2c7   : > { %v3500_v4 = vadd.f32 %v2267_v2, %v3473_v45 }
 0x2c8   : > { %v2269_v40 = vpop.f32.mrf.mxu1 }
 0x2c9   : > { %v2270_v54 = vadd.f32 %v2269_v40, %v2268_v16  ;;  %1686 = vmax.xlane.f32.xlu0 %v3500_v4 }
 0x2ca   : > { %v2271_v25 = vpop.f32.mrf.mxu1 }
 0x2cb   : > { %v3504_v57 = vadd.f32 %v2270_v54, %v3473_v45 }
 0x2cc   : > { %v2272_v56 = vpop.f32.mrf.mxu1 }
 0x2cd   : > { %v2273_v18 = vadd.f32 %v2272_v56, %v2271_v25  ;;  %1688 = vmax.xlane.f32.xlu1 %v3504_v57 }
 0x2ce   : > { %v2274_v53 = vpop.f32.mrf.mxu1 }
 0x2cf   : > { %v3508_v6 = vadd.f32 %v2273_v18, %v3473_v45 }
 0x2d0   : > { %v2275_v0 = vpop.f32.mrf.mxu1 }
 0x2d1   : > { %v2276_v14 = vadd.f32 %v2275_v0, %v2274_v53  ;;  %1690 = vmax.xlane.f32.xlu0 %v3508_v6 }
 0x2d2   : > { %v2277_v19 = vpop.f32.mrf.mxu1 }
 0x2d3   : > { %v3512_v28 = vadd.f32 %v2276_v14, %v3473_v45 }
 0x2d4   : > { %v2278_v22 = vpop.f32.mrf.mxu1 }
 0x2d5   : > { %v2279_v46 = vadd.f32 %v2278_v22, %v2277_v19  ;;  %1692 = vmax.xlane.f32.xlu1 %v3512_v28 }
 0x2d6   : > { %v2280_v7 = vpop.f32.mrf.mxu1 }
 0x2d7   : > { %v3516_v58 = vadd.f32 %v2279_v46, %v3473_v45 }
 0x2d8   : > { %v2281_v23 = vpop.f32.mrf.mxu1 }
 0x2d9   : > { %v2282_v9 = vadd.f32 %v2281_v23, %v2280_v7  ;;  %1694 = vmax.xlane.f32.xlu0 %v3516_v58 }
 0x2da   : > { %v2283_v55 = vpop.f32.mrf.mxu1 }
 0x2db   : > { %v3520_v49 = vadd.f32 %v2282_v9, %v3473_v45 }
 0x2dc   : > { %v2284_v63 = vpop.f32.mrf.mxu1 }
 0x2dd   : > { %v2285_v10 = vadd.f32 %v2284_v63, %v2283_v55  ;;  %1696 = vmax.xlane.f32.xlu1 %v3520_v49 }
 0x2de   : > { %v2286_v5 = vpop.f32.mrf.mxu1 }
 0x2df   : > { %v3524_v26 = vadd.f32 %v2285_v10, %v3473_v45 }
 0x2e0   : > { %v2287_v29 = vpop.f32.mrf.mxu1 }
 0x2e1   : > { %v2288_v34 = vadd.f32 %v2287_v29, %v2286_v5  ;;  %1698 = vmax.xlane.f32.xlu0 %v3524_v26 }
 0x2e2   : > { %v2289_v60 = vpop.f32.mrf.mxu1 }
 0x2e3   : > { %v3528_v17 = vadd.f32 %v2288_v34, %v3473_v45 }
 0x2e4   : > { %v2290_v59 = vpop.f32.mrf.mxu1 }
 0x2e5   : > { %v2291_v27 = vadd.f32 %v2290_v59, %v2289_v60  ;;  %1700 = vmax.xlane.f32.xlu1 %v3528_v17 }
 0x2e6   : > { %v2292_v12 = vpop.f32.mrf.mxu1 }
 0x2e7   : > { %v3532_v31 = vadd.f32 %v2291_v27, %v3473_v45 }
 0x2e8   : > { %v2293_v33 = vpop.f32.mrf.mxu1 }
 0x2e9   : > { %v2294_v35 = vadd.f32 %v2293_v33, %v2292_v12  ;;  %1702 = vmax.xlane.f32.xlu0 %v3532_v31 }
 0x2ea   : > { %v2295_v37 = vpop.f32.mrf.mxu1 }
 0x2eb   : > { %v3536_v39 = vadd.f32 %v2294_v35, %v3473_v45 }
 0x2ec   : > { %v2296_v42 = vpop.f32.mrf.mxu1 }
 0x2ed   : > { %v2297_v44 = vadd.f32 %v2296_v42, %v2295_v37  ;;  %1704 = vmax.xlane.f32.xlu1 %v3536_v39 }
 0x2ee   : > { %v2298_v43 = vpop.f32.mrf.mxu1 }
 0x2ef   : > { %v3540_v48 = vadd.f32 %v2297_v44, %v3473_v45 }
 0x2f0   : > { %v2299_v38 = vpop.f32.mrf.mxu1 }
 0x2f1   : > { %v2300_v30 = vadd.f32 %v2299_v38, %v2298_v43  ;;  %1706 = vmax.xlane.f32.xlu0 %v3540_v48 }
 0x2f2   : > { %v2301_v47 = vpop.f32.mrf.mxu1 }
 0x2f3   : > { %v3544_v24 = vadd.f32 %v2300_v30, %v3473_v45 }
 0x2f4   : > { %v2302_v51 = vpop.f32.mrf.mxu1 }
 0x2f5   : > { %v2303_v50 = vadd.f32 %v2302_v51, %v2301_v47  ;;  %1708 = vmax.xlane.f32.xlu1 %v3544_v24 }
 0x2f6   : > { %v2304_v61 = vpop.f32.mrf.mxu1 }
 0x2f7   : > { %v3548_v36 = vadd.f32 %v2303_v50, %v3473_v45 }
 0x2f8   : > { %v2305_v32 = vpop.f32.mrf.mxu1 }
 0x2f9   : > { %v2306_v1 = vadd.f32 %v2305_v32, %v2304_v61  ;;  %1710 = vmax.xlane.f32.xlu0 %v3548_v36 }
 0x2fa   : > { %v2307_v13 = vpop.f32.mrf.mxu1 }
 0x2fb   : > { %v3552_v3 = vadd.f32 %v2306_v1, %v3473_v45 }
 0x2fc   : > { %v2308_v15 = vpop.f32.mrf.mxu1 }
 0x2fd   : > { %v2309_v8 = vadd.f32 %v2308_v15, %v2307_v13  ;;  %1712 = vmax.xlane.f32.xlu1 %v3552_v3 }
 0x2fe   : > { %v2310_v2 = vpop.f32.mrf.mxu1 }
 0x2ff   : > { %v3556_v16 = vadd.f32 %v2309_v8, %v3473_v45 }
 0x300   : > { %v2311_v40 = vpop.f32.mrf.mxu1 }
 0x301   : > { %v2312_v54 = vadd.f32 %v2311_v40, %v2310_v2  ;;  %1714 = vmax.xlane.f32.xlu0 %v3556_v16 }
 0x302   : > { %v2313_v25 = vpop.f32.mrf.mxu1 }
 0x303   : > { %v3560_v56 = vadd.f32 %v2312_v54, %v3473_v45 }
 0x304   : > { %v2314_v18 = vpop.f32.mrf.mxu1 }
 0x305   : > { %v2315_v53 = vadd.f32 %v2314_v18, %v2313_v25  ;;  %1716 = vmax.xlane.f32.xlu1 %v3560_v56 }
 0x306   : > { %v2316_v0 = vpop.f32.mrf.mxu1 }
 0x307   : > { %v3564_v14 = vadd.f32 %v2315_v53, %v3473_v45 }
 0x308   : > { %v2317_v19 = vpop.f32.mrf.mxu1 }
 0x309   : > { %v2318_v22 = vadd.f32 %v2317_v19, %v2316_v0  ;;  %1718 = vmax.xlane.f32.xlu0 %v3564_v14 }
 0x30a   : > { %v2319_v46 = vpop.f32.mrf.mxu1 }
 0x30b   : > { %v3568_v7 = vadd.f32 %v2318_v22, %v3473_v45 }
 0x30c   : > { %v2320_v23 = vpop.f32.mrf.mxu1 }
 0x30d   : > { %v2321_v9 = vadd.f32 %v2320_v23, %v2319_v46  ;;  %1720 = vmax.xlane.f32.xlu1 %v3568_v7 }
 0x30e   : > { %v2322_v55 = vpop.f32.mrf.mxu1 }
 0x30f   : > { %v3572_v63 = vadd.f32 %v2321_v9, %v3473_v45 }
 0x310   : > { %v2323_v10 = vpop.f32.mrf.mxu1 }
 0x311   : > { %v2324_v5 = vadd.f32 %v2323_v10, %v2322_v55  ;;  %1722 = vmax.xlane.f32.xlu0 %v3572_v63 }
 0x312   : > { %v2325_v29 = vpop.f32.mrf.mxu1 }
 0x313   : > { %v3576_v34 = vadd.f32 %v2324_v5, %v3473_v45 }
 0x314   : > { %v2326_v60 = vpop.f32.mrf.mxu1 }
 0x315   : > { %v2327_v59 = vadd.f32 %v2326_v60, %v2325_v29  ;;  %1724 = vmax.xlane.f32.xlu1 %v3576_v34 }
 0x316   : > { %v2328_v27 = vpop.f32.mrf.mxu1 }
 0x317   : > { %v3580_v12 = vadd.f32 %v2327_v59, %v3473_v45 }
 0x318   : > { %v2329_v33 = vpop.f32.mrf.mxu1 }
 0x319   : > { %v2330_v35 = vadd.f32 %v2329_v33, %v2328_v27  ;;  %1726 = vmax.xlane.f32.xlu0 %v3580_v12 }
 0x31a   : > { %v2331_v37 = vpop.f32.mrf.mxu1 }
 0x31b   : > { %v3584_v42 = vadd.f32 %v2330_v35, %v3473_v45 }
 0x31c   : > { %v2332_v44 = vpop.f32.mrf.mxu1 }
 0x31d   : > { %v2333_v43 = vadd.f32 %v2332_v44, %v2331_v37  ;;  %1728 = vmax.xlane.f32.xlu1 %v3584_v42 }
 0x31e   : > { %v2334_v38 = vpop.f32.mrf.mxu1 }
 0x31f   : > { %v3588_v30 = vadd.f32 %v2333_v43, %v3473_v45 }
 0x320   : > { %v2335_v47 = vpop.f32.mrf.mxu1 }
 0x321   : > { %v2336_v51 = vadd.f32 %v2335_v47, %v2334_v38  ;;  %1730 = vmax.xlane.f32.xlu0 %v3588_v30 }
 0x322   : > { %v2337_v50 = vpop.f32.mrf.mxu1 }
 0x323   : > { %v3592_v61 = vadd.f32 %v2336_v51, %v3473_v45 }
 0x324   : > { %v2338_v32 = vpop.f32.mrf.mxu1 }
 0x325   : > { %v2339_v1 = vadd.f32 %v2338_v32, %v2337_v50  ;;  %1732 = vmax.xlane.f32.xlu1 %v3592_v61 }
 0x326   : > { %v2340_v13 = vpop.f32.mrf.mxu1 }
 0x327   : > { %v3596_v15 = vadd.f32 %v2339_v1, %v3473_v45 }
 0x328   : > { %v2341_v8 = vpop.f32.mrf.mxu1 }
 0x329   : > { %v2342_v2 = vadd.f32 %v2341_v8, %v2340_v13  ;;  %1734 = vmax.xlane.f32.xlu0 %v3596_v15 }
 0x32b   : > { %v3600_v40 = vadd.f32 %v2342_v2, %v3473_v45 }
 0x32d   : > { %1736 = vmax.xlane.f32.xlu1 %v3600_v40 }
 0x33a   : > { %v1675_v54 = vpop.xlane.xlu0 %1674 }
 0x33b   : > { %v1738_v25 = vsub.f32 %v3476_v41, %v1675_v54 }
 0x33d   : > { %v1770_v18 = vmul.f32 1.442695, %v1738_v25 }
 0x33e   : > { %v1677_v53 = vpop.xlane.xlu0 %1676 }
 0x33f   : > { %2590 = vpow2.f32 %v1770_v18  ;;  %v1739_v0 = vsub.f32 %v3480_v11, %v1677_v53 }
 0x341   : > { %v1772_v19 = vmul.f32 1.442695, %v1739_v0 }
 0x342   : > { %v1679_v22 = vpop.xlane.xlu1 %1678 }
 0x343   : > { %2592 = vpow2.f32 %v1772_v19  ;;  %v1740_v46 = vsub.f32 %v3484_v62, %v1679_v22 }
 0x345   : > { %v1774_v23 = vmul.f32 1.442695, %v1740_v46 }
 0x346   : > { %v1681_v9 = vpop.xlane.xlu1 %1680 }
 0x347   : > { %2594 = vpow2.f32 %v1774_v23  ;;  %v1741_v45 = vsub.f32 %v3488_v52, %v1681_v9 }
 0x349   : > { %v1776_v55 = vmul.f32 1.442695, %v1741_v45 }
 0x34a   : > { %v1683_v10 = vpop.xlane.xlu0 %1682 }
 0x34b   : > { %2596 = vpow2.f32 %v1776_v55  ;;  %v1742_v41 = vsub.f32 %v3492_v20, %v1683_v10 }
 0x34c   : > { %v3608_v5 = vpop.eup %2590 }
 0x34d   : > { %v1778_v29 = vmul.f32 1.442695, %v1742_v41  ;;  %1834 = vadd.xlane.f32.xlu0 %v3608_v5 }
 0x34e   : > { %v1685_v11 = vpop.xlane.xlu1 %1684 }
 0x34f   : > { %2598 = vpow2.f32 %v1778_v29  ;;  %v1743_v60 = vsub.f32 %v3496_v21, %v1685_v11 }
 0x350   : > { %v3612_v62 = vpop.eup %2592 }
 0x351   : > { %v1780_v59 = vmul.f32 1.442695, %v1743_v60  ;;  %1836 = vadd.xlane.f32.xlu1 %v3612_v62 }
 0x352   : > { %v1687_v52 = vpop.xlane.xlu0 %1686 }
 0x353   : > { %2600 = vpow2.f32 %v1780_v59  ;;  %v1744_v27 = vsub.f32 %v3500_v4, %v1687_v52 }
 0x354   : > { %v3616_v33 = vpop.eup %2594 }
 0x355   : > { %v1782_v20 = vmul.f32 1.442695, %v1744_v27  ;;  %1838 = vadd.xlane.f32.xlu0 %v3616_v33 }
 0x356   : > { %v1689_v35 = vpop.xlane.xlu1 %1688 }
 0x357   : > { %2602 = vpow2.f32 %v1782_v20  ;;  %v1745_v37 = vsub.f32 %v3504_v57, %v1689_v35 }
 0x358   : > { %v3620_v44 = vpop.eup %2596 }
 0x359   : > { %v1784_v21 = vmul.f32 1.442695, %v1745_v37  ;;  %1840 = vadd.xlane.f32.xlu1 %v3620_v44 }
 0x35a   : > { %v1691_v43 = vpop.xlane.xlu0 %1690 }
 0x35b   : > { %2604 = vpow2.f32 %v1784_v21  ;;  %v1746_v38 = vsub.f32 %v3508_v6, %v1691_v43 }
 0x35c   : > { %v3624_v47 = vpop.eup %2598 }
 0x35d   : > { %v1786_v4 = vmul.f32 1.442695, %v1746_v38  ;;  %1842 = vadd.xlane.f32.xlu0 %v3624_v47 }
 0x35e   : > { %v1693_v51 = vpop.xlane.xlu1 %1692 }
 0x35f   : > { %2606 = vpow2.f32 %v1786_v4  ;;  %v1747_v50 = vsub.f32 %v3512_v28, %v1693_v51 }
 0x360   : > { %v3628_v32 = vpop.eup %2600 }
 0x361   : > { %v1788_v57 = vmul.f32 1.442695, %v1747_v50  ;;  %1844 = vadd.xlane.f32.xlu1 %v3628_v32 }
 0x362   : > { %v1695_v1 = vpop.xlane.xlu0 %1694 }
 0x363   : > { %2608 = vpow2.f32 %v1788_v57  ;;  %v1748_v13 = vsub.f32 %v3516_v58, %v1695_v1 }
 0x364   : > { %v3632_v8 = vpop.eup %2602 }
 0x365   : > { %v1790_v6 = vmul.f32 1.442695, %v1748_v13  ;;  %1846 = vadd.xlane.f32.xlu0 %v3632_v8 }
 0x366   : > { %v1697_v2 = vpop.xlane.xlu1 %1696 }
 0x367   : > { %2610 = vpow2.f32 %v1790_v6  ;;  %v1749_v54 = vsub.f32 %v3520_v49, %v1697_v2 }
 0x368   : > { %v3636_v25 = vpop.eup %2604 }
 0x369   : > { %v1792_v28 = vmul.f32 1.442695, %v1749_v54  ;;  %1848 = vadd.xlane.f32.xlu1 %v3636_v25 }
 0x36a   : > { %v1699_v18 = vpop.xlane.xlu0 %1698 }
 0x36b   : > { %2612 = vpow2.f32 %v1792_v28  ;;  %v1750_v53 = vsub.f32 %v3524_v26, %v1699_v18 }
 0x36c   : > { %v3640_v0 = vpop.eup %2606 }
 0x36d   : > { %v1794_v58 = vmul.f32 1.442695, %v1750_v53  ;;  %1850 = vadd.xlane.f32.xlu0 %v3640_v0 }
 0x36e   : > { %v1701_v19 = vpop.xlane.xlu1 %1700 }
 0x36f   : > { %2614 = vpow2.f32 %v1794_v58  ;;  %v1751_v22 = vsub.f32 %v3528_v17, %v1701_v19 }
 0x370   : > { %v3644_v46 = vpop.eup %2608 }
 0x371   : > { %v1796_v49 = vmul.f32 1.442695, %v1751_v22  ;;  %1852 = vadd.xlane.f32.xlu1 %v3644_v46 }
 0x372   : > { %v1703_v23 = vpop.xlane.xlu0 %1702 }
 0x373   : > { %2616 = vpow2.f32 %v1796_v49  ;;  %v1752_v9 = vsub.f32 %v3532_v31, %v1703_v23 }
 0x374   : > { %v3648_v45 = vpop.eup %2610 }
 0x375   : > { %v1798_v26 = vmul.f32 1.442695, %v1752_v9  ;;  %1854 = vadd.xlane.f32.xlu0 %v3648_v45 }
 0x376   : > { %v1705_v55 = vpop.xlane.xlu1 %1704 }
 0x377   : > { %2618 = vpow2.f32 %v1798_v26  ;;  %v1753_v10 = vsub.f32 %v3536_v39, %v1705_v55 }
 0x378   : > { %v3652_v41 = vpop.eup %2612 }
 0x379   : > { %v1800_v17 = vmul.f32 1.442695, %v1753_v10  ;;  %1856 = vadd.xlane.f32.xlu1 %v3652_v41 }
 0x37a   : > { %v1707_v29 = vpop.xlane.xlu0 %1706 }
 0x37b   : > { %2620 = vpow2.f32 %v1800_v17  ;;  %v1754_v11 = vsub.f32 %v3540_v48, %v1707_v29 }
 0x37c   : > { %v3656_v60 = vpop.eup %2614 }
 0x37d   : > { %v1802_v31 = vmul.f32 1.442695, %v1754_v11  ;;  %1858 = vadd.xlane.f32.xlu0 %v3656_v60 }
 0x37e   : > { %v1709_v59 = vpop.xlane.xlu1 %1708 }
 0x37f   : > { %2622 = vpow2.f32 %v1802_v31  ;;  %v1755_v52 = vsub.f32 %v3544_v24, %v1709_v59 }
 0x380   : > { %v3660_v27 = vpop.eup %2616 }
 0x381   : > { %v1804_v39 = vmul.f32 1.442695, %v1755_v52  ;;  %1860 = vadd.xlane.f32.xlu1 %v3660_v27 }
 0x382   : > { %v1711_v20 = vpop.xlane.xlu0 %1710 }
 0x383   : > { %2624 = vpow2.f32 %v1804_v39  ;;  %v1756_v35 = vsub.f32 %v3548_v36, %v1711_v20 }
 0x384   : > { %v3664_v37 = vpop.eup %2618 }
 0x385   : > { %v1806_v48 = vmul.f32 1.442695, %v1756_v35  ;;  %1862 = vadd.xlane.f32.xlu0 %v3664_v37 }
 0x386   : > { %v1713_v21 = vpop.xlane.xlu1 %1712 }
 0x387   : > { %2626 = vpow2.f32 %v1806_v48  ;;  %v1757_v43 = vsub.f32 %v3552_v3, %v1713_v21 }
 0x388   : > { %v3668_v38 = vpop.eup %2620 }
 0x389   : > { %v1808_v24 = vmul.f32 1.442695, %v1757_v43  ;;  %1864 = vadd.xlane.f32.xlu1 %v3668_v38 }
 0x38a   : > { %v1715_v4 = vpop.xlane.xlu0 %1714 }
 0x38b   : > { %2628 = vpow2.f32 %v1808_v24  ;;  %v1758_v51 = vsub.f32 %v3556_v16, %v1715_v4 }
 0x38c   : > { %v3672_v50 = vpop.eup %2622 }
 0x38d   : > { %v1810_v36 = vmul.f32 1.442695, %v1758_v51  ;;  %1866 = vadd.xlane.f32.xlu0 %v3672_v50 }
 0x38e   : > { %v1717_v57 = vpop.xlane.xlu1 %1716 }
 0x38f   : > { %2630 = vpow2.f32 %v1810_v36  ;;  %v1759_v1 = vsub.f32 %v3560_v56, %v1717_v57 }
 0x390   : > { %v3676_v13 = vpop.eup %2624 }
 0x391   : > { %v1812_v3 = vmul.f32 1.442695, %v1759_v1  ;;  %1868 = vadd.xlane.f32.xlu1 %v3676_v13 }
 0x392   : > { %v1719_v6 = vpop.xlane.xlu0 %1718 }
 0x393   : > { %2632 = vpow2.f32 %v1812_v3  ;;  %v1760_v2 = vsub.f32 %v3564_v14, %v1719_v6 }
 0x394   : > { %v3680_v54 = vpop.eup %2626 }
 0x395   : > { %v1814_v16 = vmul.f32 1.442695, %v1760_v2  ;;  %1870 = vadd.xlane.f32.xlu0 %v3680_v54 }
 0x396   : > { %v1721_v28 = vpop.xlane.xlu1 %1720 }
 0x397   : > { %2634 = vpow2.f32 %v1814_v16  ;;  %v1761_v18 = vsub.f32 %v3568_v7, %v1721_v28 }
 0x398   : > { %v3684_v53 = vpop.eup %2628 }
 0x399   : > { %v1816_v56 = vmul.f32 1.442695, %v1761_v18  ;;  %1872 = vadd.xlane.f32.xlu1 %v3684_v53 }
 0x39a   : > { %v1723_v58 = vpop.xlane.xlu0 %1722 }
 0x39b   : > { %2636 = vpow2.f32 %v1816_v56  ;;  %v1762_v19 = vsub.f32 %v3572_v63, %v1723_v58 }
 0x39c   : > { %v3688_v22 = vpop.eup %2630 }
 0x39d   : > { %v1818_v14 = vmul.f32 1.442695, %v1762_v19  ;;  %1874 = vadd.xlane.f32.xlu0 %v3688_v22 }
 0x39e   : > { %v1725_v49 = vpop.xlane.xlu1 %1724 }
 0x39f   : > { %2638 = vpow2.f32 %v1818_v14  ;;  %v1763_v23 = vsub.f32 %v3576_v34, %v1725_v49 }
 0x3a0   : > { %v3692_v9 = vpop.eup %2632 }
 0x3a1   : > { %v1820_v7 = vmul.f32 1.442695, %v1763_v23  ;;  %1876 = vadd.xlane.f32.xlu1 %v3692_v9 }
 0x3a2   : > { %v1727_v26 = vpop.xlane.xlu0 %1726 }
 0x3a3   : > { %2640 = vpow2.f32 %v1820_v7  ;;  %v1764_v55 = vsub.f32 %v3580_v12, %v1727_v26 }
 0x3a4   : > { %v3696_v10 = vpop.eup %2634 }
 0x3a5   : > { %v1822_v63 = vmul.f32 1.442695, %v1764_v55  ;;  %1878 = vadd.xlane.f32.xlu0 %v3696_v10 }
 0x3a6   : > { %v1729_v17 = vpop.xlane.xlu1 %1728 }
 0x3a7   : > { %2642 = vpow2.f32 %v1822_v63  ;;  %v1765_v29 = vsub.f32 %v3584_v42, %v1729_v17 }
 0x3a8   : > { %v3700_v11 = vpop.eup %2636 }
 0x3a9   : > { %v1824_v34 = vmul.f32 1.442695, %v1765_v29  ;;  %1880 = vadd.xlane.f32.xlu1 %v3700_v11 }
 0x3aa   : > { %v1731_v31 = vpop.xlane.xlu0 %1730 }
 0x3ab   : > { %2644 = vpow2.f32 %v1824_v34  ;;  %v1766_v59 = vsub.f32 %v3588_v30, %v1731_v31 }
 0x3ac   : > { %v3704_v52 = vpop.eup %2638 }
 0x3ad   : > { %v1826_v12 = vmul.f32 1.442695, %v1766_v59  ;;  %1882 = vadd.xlane.f32.xlu0 %v3704_v52 }
 0x3ae   : > { %v1733_v39 = vpop.xlane.xlu1 %1732 }
 0x3af   : > { %2646 = vpow2.f32 %v1826_v12  ;;  %v1767_v20 = vsub.f32 %v3592_v61, %v1733_v39 }
 0x3b0   : > { %v3708_v35 = vpop.eup %2640 }
 0x3b1   : > { %v1828_v42 = vmul.f32 1.442695, %v1767_v20  ;;  %1884 = vadd.xlane.f32.xlu1 %v3708_v35 }
 0x3b2   : > { %v1735_v48 = vpop.xlane.xlu0 %1734 }
 0x3b3   : > { %2648 = vpow2.f32 %v1828_v42  ;;  %v1768_v21 = vsub.f32 %v3596_v15, %v1735_v48 }
 0x3b4   : > { %v3712_v43 = vpop.eup %2642 }
 0x3b5   : > { %v1830_v30 = vmul.f32 1.442695, %v1768_v21  ;;  %1886 = vadd.xlane.f32.xlu0 %v3712_v43 }
 0x3b6   : > { %v1737_v24 = vpop.xlane.xlu1 %1736 }
 0x3b7   : > { %2650 = vpow2.f32 %v1830_v30  ;;  %v1769_v4 = vsub.f32 %v3600_v40, %v1737_v24 }
 0x3b8   : > { %v3716_v51 = vpop.eup %2644 }
 0x3b9   : > { %v1832_v61 = vmul.f32 1.442695, %v1769_v4  ;;  %1888 = vadd.xlane.f32.xlu1 %v3716_v51 }
 0x3bb   : > { %2652 = vpow2.f32 %v1832_v61 }
 0x3bc   : > { %v3719_v36 = vpop.eup %2646 }
 0x3bd   : > { %1890 = vadd.xlane.f32.xlu0 %v3719_v36 }
 0x3c0   : > { %v3722_v15 = vpop.eup %2648 }
 0x3c1   : > { %1892 = vadd.xlane.f32.xlu1 %v3722_v15 }
 0x3c4   : > { %v3725_v57 = vpop.eup %2650 }
 0x3c5   : > { %1894 = vadd.xlane.f32.xlu0 %v3725_v57 }
 0x3c8   : > { %v3728_v40 = vpop.eup %2652 }
 0x3c9   : > { %1896 = vadd.xlane.f32.xlu1 %v3728_v40 }
 0x3d6   : > { %v1835_v1 = vpop.xlane.xlu0 %1834 }
 0x3d7   : > { %2654 = vrcp.f32 %v1835_v1 }
 0x3da   : > { %v1837_v3 = vpop.xlane.xlu1 %1836 }
 0x3db   : > { %2656 = vrcp.f32 %v1837_v3 }
 0x3de   : > { %v1839_v6 = vpop.xlane.xlu0 %1838 }
 0x3df   : > { %2658 = vrcp.f32 %v1839_v6 }
 0x3e2   : > { %v1841_v2 = vpop.xlane.xlu1 %1840 }
 0x3e3   : > { %2660 = vrcp.f32 %v1841_v2 }
 0x3e4   : > { %v2655_v16 = vpop.eup %2654 }
 0x3e5   : > { %v1930_v28 = vmul.f32 %v2655_v16, %v3608_v5 }
 0x3e6   : > { %v1843_v18 = vpop.xlane.xlu0 %1842 }
 0x3e7   : > { %1962 = vst [vmem:[%s3733_s14] sm:$0xff] %v1930_v28  ;;  %2662 = vrcp.f32 %v1843_v18 }
 0x3e8   : > { %v2657_v56 = vpop.eup %2656 }
 0x3e9   : > { %v1931_v58 = vmul.f32 %v2657_v56, %v3612_v62 }
 0x3ea   : > { %v1845_v19 = vpop.xlane.xlu1 %1844 }
 0x3eb   : > { %1963 = vst [vmem:[%s3733_s14 + $0x8] sm:$0xff] %v1931_v58  ;;  %2664 = vrcp.f32 %v1845_v19 }
 0x3ec   : > { %v2659_v14 = vpop.eup %2658 }
 0x3ed   : > { %v1932_v49 = vmul.f32 %v2659_v14, %v3616_v33 }
 0x3ee   : > { %v1847_v5 = vpop.xlane.xlu0 %1846 }
 0x3ef   : > { %1964 = vst [vmem:[%s3733_s14 + $0x10] sm:$0xff] %v1932_v49  ;;  %2666 = vrcp.f32 %v1847_v5 }
 0x3f0   : > { %v2661_v23 = vpop.eup %2660 }
 0x3f1   : > { %v1933_v7 = vmul.f32 %v2661_v23, %v3620_v44 }
 0x3f2   : > { %v1849_v26 = vpop.xlane.xlu1 %1848 }
 0x3f3   : > { %1965 = vst [vmem:[%s3733_s14 + $0x18] sm:$0xff] %v1933_v7  ;;  %2668 = vrcp.f32 %v1849_v26 }
 0x3f4   : > { %v2663_v55 = vpop.eup %2662 }
 0x3f5   : > { %v1934_v62 = vmul.f32 %v2663_v55, %v3624_v47 }
 0x3f6   : > { %v1851_v63 = vpop.xlane.xlu0 %1850 }
 0x3f7   : > { %1966 = vst [vmem:[%s3733_s14 + $0x20] sm:$0xff] %v1934_v62  ;;  %2670 = vrcp.f32 %v1851_v63 }
 0x3f8   : > { %v2665_v17 = vpop.eup %2664 }
 0x3f9   : > { %v1935_v33 = vmul.f32 %v2665_v17, %v3628_v32 }
 0x3fa   : > { %v1853_v29 = vpop.xlane.xlu1 %1852 }
 0x3fb   : > { %1967 = vst [vmem:[%s3733_s14 + $0x28] sm:$0xff] %v1935_v33  ;;  %2672 = vrcp.f32 %v1853_v29 }
 0x3fc   : > { %v2667_v34 = vpop.eup %2666 }
 0x3fd   : > { %v1936_v44 = vmul.f32 %v2667_v34, %v3632_v8 }
 0x3fe   : > { %v1855_v31 = vpop.xlane.xlu0 %1854 }
 0x3ff   : > { %1968 = vst [vmem:[%s3733_s14 + $0x30] sm:$0xff] %v1936_v44  ;;  %2674 = vrcp.f32 %v1855_v31 }
 0x400   : > { %v2669_v59 = vpop.eup %2668 }
 0x401   : > { %v1937_v47 = vmul.f32 %v2669_v59, %v3636_v25 }
 0x402   : > { %v1857_v12 = vpop.xlane.xlu1 %1856 }
 0x403   : > { %1969 = vst [vmem:[%s3733_s14 + $0x38] sm:$0xff] %v1937_v47  ;;  %2676 = vrcp.f32 %v1857_v12 }
 0x404   : > { %v2671_v39 = vpop.eup %2670 }
 0x405   : > { %v1938_v32 = vmul.f32 %v2671_v39, %v3640_v0 }
 0x406   : > { %v1859_v20 = vpop.xlane.xlu0 %1858 }
 0x407   : > { %1970 = vst [vmem:[%s3733_s14 + $0x40] sm:$0xff] %v1938_v32  ;;  %2678 = vrcp.f32 %v1859_v20 }
 0x408   : > { %v2673_v42 = vpop.eup %2672 }
 0x409   : > { %v1939_v8 = vmul.f32 %v2673_v42, %v3644_v46 }
 0x40a   : > { %v1861_v48 = vpop.xlane.xlu1 %1860 }
 0x40b   : > { %1971 = vst [vmem:[%s3733_s14 + $0x48] sm:$0xff] %v1939_v8  ;;  %2680 = vrcp.f32 %v1861_v48 }
 0x40c   : > { %v2675_v21 = vpop.eup %2674 }
 0x40d   : > { %v1940_v25 = vmul.f32 %v2675_v21, %v3648_v45 }
 0x40e   : > { %v1863_v30 = vpop.xlane.xlu0 %1862 }
 0x40f   : > { %1972 = vst [vmem:[%s3733_s14 + $0x50] sm:$0xff] %v1940_v25  ;;  %2682 = vrcp.f32 %v1863_v30 }
 0x410   : > { %v2677_v24 = vpop.eup %2676 }
 0x411   : > { %v1941_v0 = vmul.f32 %v2677_v24, %v3652_v41 }
 0x412   : > { %v1865_v4 = vpop.xlane.xlu1 %1864 }
 0x413   : > { %1973 = vst [vmem:[%s3733_s14 + $0x58] sm:$0xff] %v1941_v0  ;;  %2684 = vrcp.f32 %v1865_v4 }
 0x414   : > { %v2679_v61 = vpop.eup %2678 }
 0x415   : > { %v1942_v46 = vmul.f32 %v2679_v61, %v3656_v60 }
 0x416   : > { %v1867_v1 = vpop.xlane.xlu0 %1866 }
 0x417   : > { %1974 = vst [vmem:[%s3733_s14 + $0x60] sm:$0xff] %v1942_v46  ;;  %2686 = vrcp.f32 %v1867_v1 }
 0x418   : > { %v2681_v3 = vpop.eup %2680 }
 0x419   : > { %v1943_v45 = vmul.f32 %v2681_v3, %v3660_v27 }
 0x41a   : > { %v1869_v6 = vpop.xlane.xlu1 %1868 }
 0x41b   : > { %1975 = vst [vmem:[%s3733_s14 + $0x68] sm:$0xff] %v1943_v45  ;;  %2688 = vrcp.f32 %v1869_v6 }
 0x41c   : > { %v2683_v2 = vpop.eup %2682 }
 0x41d   : > { %v1944_v41 = vmul.f32 %v2683_v2, %v3664_v37 }
 0x41e   : > { %v1871_v16 = vpop.xlane.xlu0 %1870 }
 0x41f   : > { %1976 = vst [vmem:[%s3733_s14 + $0x70] sm:$0xff] %v1944_v41  ;;  %2690 = vrcp.f32 %v1871_v16 }
 0x420   : > { %v2685_v28 = vpop.eup %2684 }
 0x421   : > { %v1945_v60 = vmul.f32 %v2685_v28, %v3668_v38 }
 0x422   : > { %v1873_v18 = vpop.xlane.xlu1 %1872 }
 0x423   : > { %1977 = vst [vmem:[%s3733_s14 + $0x78] sm:$0xff] %v1945_v60  ;;  %2692 = vrcp.f32 %v1873_v18 }
 0x424   : > { %v2687_v56 = vpop.eup %2686 }
 0x425   : > { %v1946_v27 = vmul.f32 %v2687_v56, %v3672_v50 }
 0x426   : > { %v1875_v58 = vpop.xlane.xlu0 %1874 }
 0x427   : > { %1978 = vst [vmem:[%s3733_s14 + $0x80] sm:$0xff] %v1946_v27  ;;  %2694 = vrcp.f32 %v1875_v58 }
 0x428   : > { %v2689_v19 = vpop.eup %2688 }
 0x429   : > { %v1947_v37 = vmul.f32 %v2689_v19, %v3676_v13 }
 0x42a   : > { %v1877_v14 = vpop.xlane.xlu1 %1876 }
 0x42b   : > { %1979 = vst [vmem:[%s3733_s14 + $0x88] sm:$0xff] %v1947_v37  ;;  %2696 = vrcp.f32 %v1877_v14 }
 0x42c   : > { %v2691_v49 = vpop.eup %2690 }
 0x42d   : > { %v1948_v38 = vmul.f32 %v2691_v49, %v3680_v54 }
 0x42e   : > { %v1879_v5 = vpop.xlane.xlu0 %1878 }
 0x42f   : > { %1980 = vst [vmem:[%s3733_s14 + $0x90] sm:$0xff] %v1948_v38  ;;  %2698 = vrcp.f32 %v1879_v5 }
 0x430   : > { %v2693_v23 = vpop.eup %2692 }
 0x431   : > { %v1949_v50 = vmul.f32 %v2693_v23, %v3684_v53 }
 0x432   : > { %v1881_v7 = vpop.xlane.xlu1 %1880 }
 0x433   : > { %1981 = vst [vmem:[%s3733_s14 + $0x98] sm:$0xff] %v1949_v50  ;;  %2700 = vrcp.f32 %v1881_v7 }
 0x434   : > { %v2695_v26 = vpop.eup %2694 }
 0x435   : > { %v1950_v13 = vmul.f32 %v2695_v26, %v3688_v22 }
 0x436   : > { %v1883_v55 = vpop.xlane.xlu0 %1882 }
 0x437   : > { %1982 = vst [vmem:[%s3733_s14 + $0xa0] sm:$0xff] %v1950_v13  ;;  %2702 = vrcp.f32 %v1883_v55 }
 0x438   : > { %v2697_v62 = vpop.eup %2696 }
 0x439   : > { %v1951_v54 = vmul.f32 %v2697_v62, %v3692_v9 }
 0x43a   : > { %v1885_v63 = vpop.xlane.xlu1 %1884 }
 0x43b   : > { %1983 = vst [vmem:[%s3733_s14 + $0xa8] sm:$0xff] %v1951_v54  ;;  %2704 = vrcp.f32 %v1885_v63 }
 0x43c   : > { %v2699_v17 = vpop.eup %2698 }
 0x43d   : > { %v1952_v53 = vmul.f32 %v2699_v17, %v3696_v10 }
 0x43e   : > { %v1887_v33 = vpop.xlane.xlu0 %1886 }
 0x43f   : > { %1984 = vst [vmem:[%s3733_s14 + $0xb0] sm:$0xff] %v1952_v53  ;;  %2706 = vrcp.f32 %v1887_v33 }
 0x440   : > { %v2701_v29 = vpop.eup %2700 }
 0x441   : > { %v1953_v22 = vmul.f32 %v2701_v29, %v3700_v11 }
 0x442   : > { %v1889_v34 = vpop.xlane.xlu1 %1888 }
 0x443   : > { %1985 = vst [vmem:[%s3733_s14 + $0xb8] sm:$0xff] %v1953_v22  ;;  %2708 = vrcp.f32 %v1889_v34 }
 0x444   : > { %v2703_v44 = vpop.eup %2702 }
 0x445   : > { %v1954_v9 = vmul.f32 %v2703_v44, %v3704_v52 }
 0x446   : > { %v1891_v31 = vpop.xlane.xlu0 %1890 }
 0x447   : > { %1986 = vst [vmem:[%s3733_s14 + $0xc0] sm:$0xff] %v1954_v9  ;;  %2710 = vrcp.f32 %v1891_v31 }
 0x448   : > { %v2705_v59 = vpop.eup %2704 }
 0x449   : > { %v1955_v10 = vmul.f32 %v2705_v59, %v3708_v35 }
 0x44a   : > { %v1893_v47 = vpop.xlane.xlu1 %1892 }
 0x44b   : > { %1987 = vst [vmem:[%s3733_s14 + $0xc8] sm:$0xff] %v1955_v10  ;;  %2712 = vrcp.f32 %v1893_v47 }
 0x44c   : > { %v2707_v11 = vpop.eup %2706 }
 0x44d   : > { %v1956_v12 = vmul.f32 %v2707_v11, %v3712_v43 }
 0x44e   : > { %v1895_v39 = vpop.xlane.xlu0 %1894 }
 0x44f   : > { %1988 = vst [vmem:[%s3733_s14 + $0xd0] sm:$0xff] %v1956_v12  ;;  %2714 = vrcp.f32 %v1895_v39 }
 0x450   : > { %v2709_v52 = vpop.eup %2708 }
 0x451   : > { %v1957_v32 = vmul.f32 %v2709_v52, %v3716_v51 }
 0x452   : > { %v1897_v20 = vpop.xlane.xlu1 %1896 }
 0x453   : > { %1989 = vst [vmem:[%s3733_s14 + $0xd8] sm:$0xff] %v1957_v32  ;;  %2716 = vrcp.f32 %v1897_v20 }
 0x454   : > { %v2711_v35 = vpop.eup %2710 }
 0x455   : > { %v1958_v42 = vmul.f32 %v2711_v35, %v3719_v36 }
 0x457   : > { %1990 = vst [vmem:[%s3733_s14 + $0xe0] sm:$0xff] %v1958_v42 }
 0x458   : > { %v2713_v8 = vpop.eup %2712 }
 0x459   : > { %v1959_v43 = vmul.f32 %v2713_v8, %v3722_v15 }
 0x45b   : > { %1991 = vst [vmem:[%s3733_s14 + $0xe8] sm:$0xff] %v1959_v43 }
 0x45c   : > { %v2715_v48 = vpop.eup %2714 }
 0x45d   : > { %v1960_v21 = vmul.f32 %v2715_v48, %v3725_v57 }
 0x45f   : > { %1992 = vst [vmem:[%s3733_s14 + $0xf0] sm:$0xff] %v1960_v21 }
 0x460   : > { %v2717_v51 = vpop.eup %2716 }
 0x461   : > { %v1961_v36 = vmul.f32 %v2717_v51, %v3728_v40 }
 0x463   : > { %1993 = vst [vmem:[%s3733_s14 + $0xf8] sm:$0xff] %v1961_v36 }
 0x464   : > { %2811 = shalt.err (!%p2808_p9)
}
 0x465   : > { %s2812_s24 = scalar_lea.hbm %s3801_s15, 4096  ;;  %s2816_s11 = scalar_lea.hbm %s3853_s5, 8192 }
 0x466   : > { %p2813_p13 = scmp.ne.s32.totalorder %s3801_s15, %s2812_s24  ;;  %p2817_p4 = scmp.lt.s32.totalorder %s3801_s15, %s3853_s5 }
 0x467   : > { %p2818_p8 = scmp.lt.s32.totalorder %s2816_s11, %s2812_s24 }
 0x468   : > { %p2814_p5 = pnand %p2813_p13, %p3875_p10 }
 0x469   : > { %p2819_p7 = por %p2818_p8, %p2817_p4 }
 0x46a   : > { %p2815_p0 = pneg %p2814_p5 }
 0x46c   : > { %p2820_p11 = pnand %p2819_p7, %p2815_p0 }
 0x46e   : > { %2823 = shalt.err (!%p2820_p11)
}
 0x46f   : > { %s2879_s29 = smov 128   ;;  %s2880_s10 = smov 8  }
 0x470   : > { %2372 = dma.vmem_to_hbm [thread:$0]  (%p3875_p10), %s3803_s7, 4096, %s3801_s15, %s1995_s16, %s2879_s29, %s2879_s29, %s2880_s10  }
 0x471 PF: > { %s2023_s12 = sand.u32 1, %s2854_s18   ;;  %p3876_p1 = scmp.ne.s32.totalorder %s3859_s25, 0 }
 0x472   : > { %p3877_p2 = scmp.ge.s32.totalorder %s2866_s21, 2  ;;  %s2024_s27 = scalar_lea.sflag [#allocation4], %s2023_s12 }
 0x474   : > { %p2386_p6 = pnand %p3877_p2, %p3876_p1 }
 0x476   : > { %p2387_p12 = pneg %p2386_p6 }
 0x478   : > { %2849 = dma.done.wait (%p2387_p12), %s2024_s27, 4096  }
 0x479   : > { %2851 = vsyncadd (%p2387_p12), %s2024_s27, 4294963200  ;;  %p19_p3 = scmp.ge.s32.totalorder %s2983_s17, 4   ;;  %s3878_s18 = smov %s2858_s19 }
 0x47a   : > { %s3879_s19 = smov %s2862_s20  ;;  %s3880_s20 = smov %s2992_s28 }
 0x47b   : > { %s3881_s21 = smov %s2983_s17  ;;  %21 = sbr.rel (!%p19_p3) target bundleno = 6 (0x6), region = 93 }
 0x480   :  { %2029 = vsyncpa [#allocation3], 1 }
 0x481   :  { %2031 = vsyncpa [#allocation3 + $0x1], 1 }
 0x482   :  { %2032 = vsyncpa [#allocation6], 1 }
 0x483   :  { %2033 = vsyncpa [#allocation4], 1 }
 0x484   :  { %2035 = vsyncpa [#allocation4 + $0x1], 1 }

</bundles_post_ra>
